<compile_context>
chip_gen: v6e
topology: v6e:2x2x1
jax: 0.10.0
libtpu: 0.0.40
codegen_flags: <defaults>
</compile_context>

<pallas_src>
import functools

import jax
import jax.numpy as jnp
import numpy as np
from jax.experimental import pallas as pl
from jax.experimental.pallas import tpu as pltpu


def convlstm_cell_kernel(comb_ref, c_ref, w_ref, b_ref, mask_ref,
                         h_out_ref, c_out_ref, cols_ref, *, Ch, Cc_pad, K, W):
    """One grid step = one batch element, whole (lane-padded) image on lanes.

    comb_ref : (1, Cc_pad, L)      cat([x, h]) channels (zero-padded), MXU dtype
    c_ref    : (1, Ch, L)          previous cell state (caller dtype)
    w_ref    : (4*Ch, K*K*Cc_pad)  conv weight, tap-major / channel-minor
    b_ref    : (4*Ch, 1)           conv bias (f32)
    mask_ref : (K*K, L)            per-tap validity masks (0/1, MXU dtype)
    h_out_ref, c_out_ref : (1, Ch, L)
    cols_ref : (K*K*Cc_pad, L)     VMEM scratch: in-kernel im2col columns
    """
    L = cols_ref.shape[1]
    p = K // 2
    slab = comb_ref[0]                       # (Cc_pad, L), loaded once
    mvals = mask_ref[...]                    # (K*K, L)

    # --- in-kernel im2col: lane rolls (XLU) + boundary masks (VPU) -----------
    # out[g] = slab[g + dy*W + dx] for in-bounds taps, else 0 (== conv zero-pad).
    for t in range(K * K):                   # static unrolled K*K taps
        dy, dx = t // K - p, t % K - p
        shift = (-(dy * W + dx)) % L
        shifted = pltpu.roll(slab, shift, axis=1) if shift else slab
        cols_ref[t * Cc_pad:(t + 1) * Cc_pad, :] = shifted * mvals[t:t + 1, :]

    # --- single deep MXU matmul (f32 accumulation) + bias --------------------
    gates = jnp.dot(w_ref[...], cols_ref[...],
                    preferred_element_type=jnp.float32) + b_ref[...]

    # --- gates: sigmoid as one tanh each (single EUP op per gate) ------------
    def sig(z):
        return 0.5 * jnp.tanh(0.5 * z) + 0.5

    # Gate order matches torch.split: in, remember, cell, out.
    # (Ch is a multiple of 8 here so these slices stay sublane-aligned; pad Ch
    # in the wrapper if that ever stops being true.)
    ingate = sig(gates[0 * Ch:1 * Ch])
    remembergate = sig(gates[1 * Ch:2 * Ch])
    cellgate = jnp.tanh(gates[2 * Ch:3 * Ch])
    outgate = sig(gates[3 * Ch:4 * Ch])

    c_old = c_ref[0].astype(jnp.float32)     # recurrent math always in f32
    c_new = remembergate * c_old + ingate * cellgate
    h_new = outgate * jnp.tanh(c_new)

    h_out_ref[0] = h_new.astype(h_out_ref.dtype)   # unmasked lane-dense stores
    c_out_ref[0] = c_new.astype(c_out_ref.dtype)


def _round_up(n, m):
    return -(-n // m) * m


def _vmem_limit_bytes(step_bytes):
    """Per-step estimate -> explicit limit, clamped to this chip's VMEM."""
    try:
        cap = int(pltpu.get_tpu_info().vmem_capacity_bytes)   # 64 MiB v7x, 128 MiB v5e/v6e
    except Exception:
        cap = 64 * 1024 * 1024                                # conservative (v7x)
    want = int(step_bytes * 1.5) + (8 << 20)
    return max(32 << 20, min(want, int(cap * 0.75)))


def conv_lstm_cell(x_nchw, h_nchw, c_nchw, weight, bias, kernel_size, *,
                   compute_dtype=jnp.bfloat16, core_parallel=False):
    """PyTorch-semantics ConvLSTMCell.forward.

    x_nchw : (B, Cin, H, W);  h_nchw, c_nchw : (B, Ch, H, W)
    weight : (4*Ch, Cin+Ch, K, K)  (nn.Conv2d OIHW);  bias : (4*Ch,)
    compute_dtype : dtype of the MXU operands.  bf16 is recommended on all of
        v5e/v6e/v7x (native MXU dtype, halves the dominant HBM stream);
        accumulation, gate math and the c/h state stay f32 / caller dtype, so
        the recurrent state is never re-quantized across timesteps.  Pass
        jnp.float32 (or None) for a bit-tight match to an f32 reference.
    core_parallel : map the batch grid axis with pltpu.CORE_PARALLEL
        (v7x: engages the second TensorCore; B should be shardable).
    Returns (h_new, c_new) in NCHW, caller dtype.
    """
    B, Cin, H, W = x_nchw.shape
    Ch = h_nchw.shape[1]
    K = int(kernel_size)
    assert K % 2 == 1, "same-size ConvLSTM assumes an odd kernel size"
    p = K // 2
    Cc = Cin + Ch
    HW = H * W
    out_dtype = x_nchw.dtype
    if compute_dtype is None:
        compute_dtype = x_nchw.dtype
    cbytes = np.dtype(compute_dtype).itemsize
    sub = 8 * max(1, 4 // cbytes)            # sublane granule: 8 (f32) / 16 (bf16)
    Cc_pad = _round_up(Cc, sub)
    L = _round_up(HW, 128)                   # lane-dense spatial extent
    Kc = K * K * Cc_pad                      # contraction depth (no HBM pad)

    # Combined activations: cat([x, h]) -> channel-first (B, Cc_pad, L) slab in
    # the matmul dtype.  This is the only wrapper-side materialization (no K*K
    # im2col expansion in HBM any more).
    # TODO(synk): feed x and h as separate kernel inputs to skip this concat pass.
    comb = jnp.concatenate([x_nchw.reshape(B, Cin, HW),
                            h_nchw.reshape(B, Ch, HW)], axis=1)
    comb = jnp.pad(comb.astype(compute_dtype),
                   ((0, 0), (0, Cc_pad - Cc), (0, L - HW)))

    # Weight (4Ch, Cc, K, K) -> tap-major / channel-minor (4Ch, K*K*Cc_pad).
    w2 = jnp.transpose(weight, (0, 2, 3, 1)).reshape(4 * Ch, K * K, Cc)
    w2 = jnp.pad(w2, ((0, 0), (0, 0), (0, Cc_pad - Cc)))
    w2 = w2.reshape(4 * Ch, Kc).astype(compute_dtype)
    b2 = bias.reshape(4 * Ch, 1).astype(jnp.float32)

    # Per-tap validity masks over the flattened (padded) spatial axis: zero out
    # contributions whose source pixel is outside the image (== conv zero-pad).
    q = jnp.arange(L, dtype=jnp.int32)
    y, xq, in_img = q // W, q % W, q < HW
    masks = jnp.stack(
        [in_img & (y + dy >= 0) & (y + dy < H) & (xq + dx >= 0) & (xq + dx < W)
         for dy in range(-p, p + 1) for dx in range(-p, p + 1)],
        axis=0).astype(compute_dtype)                    # (K*K, L)

    c_flat = c_nchw.reshape(B, Ch, HW)
    if L != HW:
        c_flat = jnp.pad(c_flat, ((0, 0), (0, 0), (0, L - HW)))

    kernel = functools.partial(convlstm_cell_kernel,
                               Ch=Ch, Cc_pad=Cc_pad, K=K, W=W)

    # Per-grid-step VMEM estimate (double-buffered ins/outs + scratch + temps).
    step_bytes = (2 * Cc_pad * L * cbytes
                  + 2 * Ch * L * np.dtype(c_flat.dtype).itemsize
                  + 4 * Ch * L * np.dtype(out_dtype).itemsize
                  + Kc * L * cbytes
                  + 2 * 4 * Ch * Kc * cbytes
                  + 2 * K * K * L * cbytes
                  + 16 * Ch * L * 4)

    batch_sem = pltpu.CORE_PARALLEL if core_parallel else "parallel"

    def call(invariant_kwargs):
        return pl.pallas_call(
            kernel,
            out_shape=(jax.ShapeDtypeStruct((B, Ch, L), out_dtype),
                       jax.ShapeDtypeStruct((B, Ch, L), out_dtype)),
            grid_spec=pltpu.PrefetchScalarGridSpec(
                num_scalar_prefetch=0,
                grid=(B,),
                in_specs=[
                    pl.BlockSpec((1, Cc_pad, L), lambda b: (b, 0, 0)),
                    pl.BlockSpec((1, Ch, L), lambda b: (b, 0, 0)),
                    # grid-invariant blocks (constant index map -> no re-DMA)
                    pl.BlockSpec((4 * Ch, Kc), lambda b: (0, 0), **invariant_kwargs),
                    pl.BlockSpec((4 * Ch, 1), lambda b: (0, 0), **invariant_kwargs),
                    pl.BlockSpec((K * K, L), lambda b: (0, 0), **invariant_kwargs),
                ],
                out_specs=[
                    pl.BlockSpec((1, Ch, L), lambda b: (b, 0, 0)),
                    pl.BlockSpec((1, Ch, L), lambda b: (b, 0, 0)),
                ],
                scratch_shapes=[pltpu.VMEM((Kc, L), compute_dtype)]),
            compiler_params=pltpu.CompilerParams(
                dimension_semantics=(batch_sem,),
                vmem_limit_bytes=_vmem_limit_bytes(step_bytes)),
        )(comb, c_flat, w2, b2, masks)

    try:
        # Grid-invariant blocks never re-DMA, so one buffer is enough.
        h_new, c_new = call({"pipeline_mode": pl.Buffered(1)})
    except Exception:
        # pipeline_mode / Buffered(1) unsupported on this JAX build: fall back
        # to default double-buffering (small VMEM waste, identical results).
        h_new, c_new = call({})

    if L != HW:
        h_new, c_new = h_new[..., :HW], c_new[..., :HW]
    return h_new.reshape(B, Ch, H, W), c_new.reshape(B, Ch, H, W)


def conv_lstm_cell_reference(x, h, c, weight, bias, kernel_size):
    """Pure-JAX reference mirroring the PyTorch module (NCHW conv)."""
    p = kernel_size // 2
    Ch = h.shape[1]
    combined = jnp.concatenate([x, h], axis=1)
    gates = jax.lax.conv_general_dilated(
        combined, weight, window_strides=(1, 1),
        padding=((p, p), (p, p)),
        dimension_numbers=("NCHW", "OIHW", "NCHW")) + bias[None, :, None, None]
    ingate = jax.nn.sigmoid(gates[:, 0 * Ch:1 * Ch])
    remembergate = jax.nn.sigmoid(gates[:, 1 * Ch:2 * Ch])
    cellgate = jnp.tanh(gates[:, 2 * Ch:3 * Ch])
    outgate = jax.nn.sigmoid(gates[:, 3 * Ch:4 * Ch])
    c_new = remembergate * c + ingate * cellgate
    h_new = outgate * jnp.tanh(c_new)
    return h_new, c_new


if __name__ == "__main__":
    B, Cin, Ch, H, W, K = 2, 4, 8, 16, 16, 3

    key = jax.random.PRNGKey(0)
    kx_, kh_, kc_, kw_, kb_ = jax.random.split(key, 5)

    x = jax.random.normal(kx_, (B, Cin, H, W), jnp.float32)
    h0 = jax.random.normal(kh_, (B, Ch, H, W), jnp.float32)
    c0 = jax.random.normal(kc_, (B, Ch, H, W), jnp.float32)

    # Deterministic params (shapes match nn.Conv2d(Cin+Ch, 4*Ch, K, pad=K//2)).
    fan_in = (Cin + Ch) * K * K
    bound = 1.0 / (fan_in ** 0.5)
    weight = jax.random.uniform(kw_, (4 * Ch, Cin + Ch, K, K), jnp.float32,
                                minval=-bound, maxval=bound)
    bias = jax.random.uniform(kb_, (4 * Ch,), jnp.float32,
                              minval=-bound, maxval=bound)

    h_expect, c_expect = conv_lstm_cell_reference(x, h0, c0, weight, bias, K)

    # Exact path: f32 MXU operands.
    h32, c32 = conv_lstm_cell(x, h0, c0, weight, bias, K,
                              compute_dtype=jnp.float32)
    jax.block_until_ready((h32, c32))
    assert jnp.allclose(h32, h_expect, atol=1e-4, rtol=1e-4)
    assert jnp.allclose(c32, c_expect, atol=1e-4, rtol=1e-4)

    # Default fast path: bf16 MXU operands (v5e/v6e/v7x), f32 accumulation and
    # f32 recurrent-state math; looser tolerance.
    hbf, cbf = conv_lstm_cell(x, h0, c0, weight, bias, K)
    jax.block_until_ready((hbf, cbf))
    assert jnp.allclose(hbf, h_expect, atol=5e-2, rtol=5e-2)
    assert jnp.allclose(cbf, c_expect, atol=5e-2, rtol=5e-2)

    print("KERNEL_OK")
</pallas_src>

<mosaic_0001>
module attributes {stable_mosaic.version = 11 : i64} {
  func.func @convlstm_cell_kernel(%arg0: i32, %arg1: memref<1x16x256xf32, #tpu.memory_space<vmem>>, %arg2: memref<1x8x256xf32, #tpu.memory_space<vmem>>, %arg3: memref<32x144xf32, #tpu.memory_space<vmem>>, %arg4: memref<32x1xf32, #tpu.memory_space<vmem>>, %arg5: memref<9x256xf32, #tpu.memory_space<vmem>>, %arg6: memref<1x8x256xf32, #tpu.memory_space<vmem>>, %arg7: memref<1x8x256xf32, #tpu.memory_space<vmem>>, %arg8: memref<144x256xf32, #tpu.memory_space<vmem>>) attributes {dimension_semantics = [#tpu.dimension_semantics<parallel>], iteration_bounds = array<i64: 2>, scalar_prefetch = 0 : i64, scratch_operands = 1 : i64, tpu.core_type = #tpu.core_type<tc>, window_params = [{transform_indices = @transform_0, window_bounds = array<i64: 1, 16, 256>}, {transform_indices = @transform_1, window_bounds = array<i64: 1, 8, 256>}, {pipeline_mode = #tpu.pipeline_mode<synchronous>, transform_indices = @transform_2, window_bounds = array<i64: 32, 144>}, {pipeline_mode = #tpu.pipeline_mode<synchronous>, transform_indices = @transform_3, window_bounds = array<i64: 32, 1>}, {pipeline_mode = #tpu.pipeline_mode<synchronous>, transform_indices = @transform_4, window_bounds = array<i64: 9, 256>}, {transform_indices = @transform_5, window_bounds = array<i64: 1, 8, 256>}, {transform_indices = @transform_6, window_bounds = array<i64: 1, 8, 256>}]} {
    %c0 = arith.constant 0 : index
    %c0_0 = arith.constant 0 : index
    %c0_1 = arith.constant 0 : index
    %0 = vector.load %arg1[%c0, %c0_0, %c0_1] : memref<1x16x256xf32, #tpu.memory_space<vmem>>, vector<1x16x256xf32>
    %1 = vector.shape_cast %0 : vector<1x16x256xf32> to vector<16x256xf32>
    %c0_2 = arith.constant 0 : index
    %c0_3 = arith.constant 0 : index
    %2 = vector.load %arg5[%c0_2, %c0_3] : memref<9x256xf32, #tpu.memory_space<vmem>>, vector<9x256xf32>
    %c17_i32 = arith.constant 17 : i32
    %3 = tpu.dynamic_rotate %1 by %c17_i32 dim 1 : vector<16x256xf32>, i32 -> vector<16x256xf32>
    %4 = vector.extract_strided_slice %2 {offsets = [0, 0], sizes = [1, 256], strides = [1, 1]} : vector<9x256xf32> to vector<1x256xf32>
    %5 = vector.broadcast %4 : vector<1x256xf32> to vector<16x256xf32>
    %6 = arith.mulf %3, %5 : vector<16x256xf32>
    %c0_4 = arith.constant 0 : index
    %c0_5 = arith.constant 0 : index
    %7 = vector.load %arg8[%c0_4, %c0_5] : memref<144x256xf32, #tpu.memory_space<vmem>>, vector<16x256xf32>
    tpu.vector_store %arg8[%c0_4, %c0_5], %6 {strides = array<i32>} : memref<144x256xf32, #tpu.memory_space<vmem>>, vector<16x256xf32>,
    %c16_i32 = arith.constant 16 : i32
    %8 = tpu.dynamic_rotate %1 by %c16_i32 dim 1 : vector<16x256xf32>, i32 -> vector<16x256xf32>
    %9 = vector.extract_strided_slice %2 {offsets = [1, 0], sizes = [1, 256], strides = [1, 1]} : vector<9x256xf32> to vector<1x256xf32>
    %10 = vector.broadcast %9 : vector<1x256xf32> to vector<16x256xf32>
    %11 = arith.mulf %8, %10 : vector<16x256xf32>
    %c16 = arith.constant 16 : index
    %c0_6 = arith.constant 0 : index
    %12 = vector.load %arg8[%c16, %c0_6] : memref<144x256xf32, #tpu.memory_space<vmem>>, vector<16x256xf32>
    tpu.vector_store %arg8[%c16, %c0_6], %11 {strides = array<i32>} : memref<144x256xf32, #tpu.memory_space<vmem>>, vector<16x256xf32>,
    %c15_i32 = arith.constant 15 : i32
    %13 = tpu.dynamic_rotate %1 by %c15_i32 dim 1 : vector<16x256xf32>, i32 -> vector<16x256xf32>
    %14 = vector.extract_strided_slice %2 {offsets = [2, 0], sizes = [1, 256], strides = [1, 1]} : vector<9x256xf32> to vector<1x256xf32>
    %15 = vector.broadcast %14 : vector<1x256xf32> to vector<16x256xf32>
    %16 = arith.mulf %13, %15 : vector<16x256xf32>
    %c32 = arith.constant 32 : index
    %c0_7 = arith.constant 0 : index
    %17 = vector.load %arg8[%c32, %c0_7] : memref<144x256xf32, #tpu.memory_space<vmem>>, vector<16x256xf32>
    tpu.vector_store %arg8[%c32, %c0_7], %16 {strides = array<i32>} : memref<144x256xf32, #tpu.memory_space<vmem>>, vector<16x256xf32>,
    %c1_i32 = arith.constant 1 : i32
    %18 = tpu.dynamic_rotate %1 by %c1_i32 dim 1 : vector<16x256xf32>, i32 -> vector<16x256xf32>
    %19 = vector.extract_strided_slice %2 {offsets = [3, 0], sizes = [1, 256], strides = [1, 1]} : vector<9x256xf32> to vector<1x256xf32>
    %20 = vector.broadcast %19 : vector<1x256xf32> to vector<16x256xf32>
    %21 = arith.mulf %18, %20 : vector<16x256xf32>
    %c48 = arith.constant 48 : index
    %c0_8 = arith.constant 0 : index
    %22 = vector.load %arg8[%c48, %c0_8] : memref<144x256xf32, #tpu.memory_space<vmem>>, vector<16x256xf32>
    tpu.vector_store %arg8[%c48, %c0_8], %21 {strides = array<i32>} : memref<144x256xf32, #tpu.memory_space<vmem>>, vector<16x256xf32>,
    %23 = vector.extract_strided_slice %2 {offsets = [4, 0], sizes = [1, 256], strides = [1, 1]} : vector<9x256xf32> to vector<1x256xf32>
    %24 = vector.broadcast %23 : vector<1x256xf32> to vector<16x256xf32>
    %25 = arith.mulf %1, %24 : vector<16x256xf32>
    %c64 = arith.constant 64 : index
    %c0_9 = arith.constant 0 : index
    %26 = vector.load %arg8[%c64, %c0_9] : memref<144x256xf32, #tpu.memory_space<vmem>>, vector<16x256xf32>
    tpu.vector_store %arg8[%c64, %c0_9], %25 {strides = array<i32>} : memref<144x256xf32, #tpu.memory_space<vmem>>, vector<16x256xf32>,
    %c255_i32 = arith.constant 255 : i32
    %27 = tpu.dynamic_rotate %1 by %c255_i32 dim 1 : vector<16x256xf32>, i32 -> vector<16x256xf32>
    %28 = vector.extract_strided_slice %2 {offsets = [5, 0], sizes = [1, 256], strides = [1, 1]} : vector<9x256xf32> to vector<1x256xf32>
    %29 = vector.broadcast %28 : vector<1x256xf32> to vector<16x256xf32>
    %30 = arith.mulf %27, %29 : vector<16x256xf32>
    %c80 = arith.constant 80 : index
    %c0_10 = arith.constant 0 : index
    %31 = vector.load %arg8[%c80, %c0_10] : memref<144x256xf32, #tpu.memory_space<vmem>>, vector<16x256xf32>
    tpu.vector_store %arg8[%c80, %c0_10], %30 {strides = array<i32>} : memref<144x256xf32, #tpu.memory_space<vmem>>, vector<16x256xf32>,
    %c241_i32 = arith.constant 241 : i32
    %32 = tpu.dynamic_rotate %1 by %c241_i32 dim 1 : vector<16x256xf32>, i32 -> vector<16x256xf32>
    %33 = vector.extract_strided_slice %2 {offsets = [6, 0], sizes = [1, 256], strides = [1, 1]} : vector<9x256xf32> to vector<1x256xf32>
    %34 = vector.broadcast %33 : vector<1x256xf32> to vector<16x256xf32>
    %35 = arith.mulf %32, %34 : vector<16x256xf32>
    %c96 = arith.constant 96 : index
    %c0_11 = arith.constant 0 : index
    %36 = vector.load %arg8[%c96, %c0_11] : memref<144x256xf32, #tpu.memory_space<vmem>>, vector<16x256xf32>
    tpu.vector_store %arg8[%c96, %c0_11], %35 {strides = array<i32>} : memref<144x256xf32, #tpu.memory_space<vmem>>, vector<16x256xf32>,
    %c240_i32 = arith.constant 240 : i32
    %37 = tpu.dynamic_rotate %1 by %c240_i32 dim 1 : vector<16x256xf32>, i32 -> vector<16x256xf32>
    %38 = vector.extract_strided_slice %2 {offsets = [7, 0], sizes = [1, 256], strides = [1, 1]} : vector<9x256xf32> to vector<1x256xf32>
    %39 = vector.broadcast %38 : vector<1x256xf32> to vector<16x256xf32>
    %40 = arith.mulf %37, %39 : vector<16x256xf32>
    %c112 = arith.constant 112 : index
    %c0_12 = arith.constant 0 : index
    %41 = vector.load %arg8[%c112, %c0_12] : memref<144x256xf32, #tpu.memory_space<vmem>>, vector<16x256xf32>
    tpu.vector_store %arg8[%c112, %c0_12], %40 {strides = array<i32>} : memref<144x256xf32, #tpu.memory_space<vmem>>, vector<16x256xf32>,
    %c239_i32 = arith.constant 239 : i32
    %42 = tpu.dynamic_rotate %1 by %c239_i32 dim 1 : vector<16x256xf32>, i32 -> vector<16x256xf32>
    %43 = vector.extract_strided_slice %2 {offsets = [8, 0], sizes = [1, 256], strides = [1, 1]} : vector<9x256xf32> to vector<1x256xf32>
    %44 = vector.broadcast %43 : vector<1x256xf32> to vector<16x256xf32>
    %45 = arith.mulf %42, %44 : vector<16x256xf32>
    %c128 = arith.constant 128 : index
    %c0_13 = arith.constant 0 : index
    %46 = vector.load %arg8[%c128, %c0_13] : memref<144x256xf32, #tpu.memory_space<vmem>>, vector<16x256xf32>
    tpu.vector_store %arg8[%c128, %c0_13], %45 {strides = array<i32>} : memref<144x256xf32, #tpu.memory_space<vmem>>, vector<16x256xf32>,
    %c0_14 = arith.constant 0 : index
    %c0_15 = arith.constant 0 : index
    %47 = vector.load %arg3[%c0_14, %c0_15] : memref<32x144xf32, #tpu.memory_space<vmem>>, vector<32x144xf32>
    %c0_16 = arith.constant 0 : index
    %c0_17 = arith.constant 0 : index
    %48 = vector.load %arg8[%c0_16, %c0_17] : memref<144x256xf32, #tpu.memory_space<vmem>>, vector<144x256xf32>
    %cst = arith.constant dense<0.000000e+00> : vector<32x256xf32>
    %49 = tpu.matmul %47, %48, %cst {dimension_numbers = #tpu.dot_dimension_numbers<[1], [0], [0], [1], [0, 0, 1, 1], [], []>} : vector<32x144xf32>, vector<144x256xf32>, vector<32x256xf32> -> vector<32x256xf32>
    %c0_18 = arith.constant 0 : index
    %c0_19 = arith.constant 0 : index
    %50 = vector.load %arg4[%c0_18, %c0_19] : memref<32x1xf32, #tpu.memory_space<vmem>>, vector<32x1xf32>
    %51 = vector.broadcast %50 : vector<32x1xf32> to vector<32x256xf32>
    %52 = arith.addf %49, %51 : vector<32x256xf32>
    %53 = vector.extract_strided_slice %52 {offsets = [0, 0], sizes = [8, 256], strides = [1, 1]} : vector<32x256xf32> to vector<8x256xf32>
    %cst_20 = arith.constant 5.000000e-01 : f32
    %54 = vector.broadcast %cst_20 : f32 to vector<8x256xf32>
    %55 = arith.mulf %54, %53 : vector<8x256xf32>
    %56 = math.tanh %55 : vector<8x256xf32>
    %cst_21 = arith.constant 5.000000e-01 : f32
    %57 = vector.broadcast %cst_21 : f32 to vector<8x256xf32>
    %58 = arith.mulf %57, %56 : vector<8x256xf32>
    %cst_22 = arith.constant 5.000000e-01 : f32
    %59 = vector.broadcast %cst_22 : f32 to vector<8x256xf32>
    %60 = arith.addf %58, %59 : vector<8x256xf32>
    %61 = vector.extract_strided_slice %52 {offsets = [8, 0], sizes = [8, 256], strides = [1, 1]} : vector<32x256xf32> to vector<8x256xf32>
    %cst_23 = arith.constant 5.000000e-01 : f32
    %62 = vector.broadcast %cst_23 : f32 to vector<8x256xf32>
    %63 = arith.mulf %62, %61 : vector<8x256xf32>
    %64 = math.tanh %63 : vector<8x256xf32>
    %cst_24 = arith.constant 5.000000e-01 : f32
    %65 = vector.broadcast %cst_24 : f32 to vector<8x256xf32>
    %66 = arith.mulf %65, %64 : vector<8x256xf32>
    %cst_25 = arith.constant 5.000000e-01 : f32
    %67 = vector.broadcast %cst_25 : f32 to vector<8x256xf32>
    %68 = arith.addf %66, %67 : vector<8x256xf32>
    %69 = vector.extract_strided_slice %52 {offsets = [16, 0], sizes = [8, 256], strides = [1, 1]} : vector<32x256xf32> to vector<8x256xf32>
    %70 = math.tanh %69 : vector<8x256xf32>
    %71 = vector.extract_strided_slice %52 {offsets = [24, 0], sizes = [8, 256], strides = [1, 1]} : vector<32x256xf32> to vector<8x256xf32>
    %cst_26 = arith.constant 5.000000e-01 : f32
    %72 = vector.broadcast %cst_26 : f32 to vector<8x256xf32>
    %73 = arith.mulf %72, %71 : vector<8x256xf32>
    %74 = math.tanh %73 : vector<8x256xf32>
    %cst_27 = arith.constant 5.000000e-01 : f32
    %75 = vector.broadcast %cst_27 : f32 to vector<8x256xf32>
    %76 = arith.mulf %75, %74 : vector<8x256xf32>
    %cst_28 = arith.constant 5.000000e-01 : f32
    %77 = vector.broadcast %cst_28 : f32 to vector<8x256xf32>
    %78 = arith.addf %76, %77 : vector<8x256xf32>
    %c0_29 = arith.constant 0 : index
    %c0_30 = arith.constant 0 : index
    %c0_31 = arith.constant 0 : index
    %79 = vector.load %arg2[%c0_29, %c0_30, %c0_31] : memref<1x8x256xf32, #tpu.memory_space<vmem>>, vector<1x8x256xf32>
    %80 = vector.shape_cast %79 : vector<1x8x256xf32> to vector<8x256xf32>
    %81 = arith.mulf %68, %80 : vector<8x256xf32>
    %82 = arith.mulf %60, %70 : vector<8x256xf32>
    %83 = arith.addf %81, %82 : vector<8x256xf32>
    %84 = math.tanh %83 : vector<8x256xf32>
    %85 = arith.mulf %78, %84 : vector<8x256xf32>
    %c0_32 = arith.constant 0 : index
    %c0_33 = arith.constant 0 : index
    %c0_34 = arith.constant 0 : index
    %86 = vector.load %arg6[%c0_32, %c0_33, %c0_34] : memref<1x8x256xf32, #tpu.memory_space<vmem>>, vector<1x8x256xf32>
    %87 = vector.shape_cast %86 : vector<1x8x256xf32> to vector<8x256xf32>
    %88 = vector.shape_cast %85 : vector<8x256xf32> to vector<1x8x256xf32>
    tpu.vector_store %arg6[%c0_32, %c0_33, %c0_34], %88 {strides = array<i32>} : memref<1x8x256xf32, #tpu.memory_space<vmem>>, vector<1x8x256xf32>,
    %c0_35 = arith.constant 0 : index
    %c0_36 = arith.constant 0 : index
    %c0_37 = arith.constant 0 : index
    %89 = vector.load %arg7[%c0_35, %c0_36, %c0_37] : memref<1x8x256xf32, #tpu.memory_space<vmem>>, vector<1x8x256xf32>
    %90 = vector.shape_cast %89 : vector<1x8x256xf32> to vector<8x256xf32>
    %91 = vector.shape_cast %83 : vector<8x256xf32> to vector<1x8x256xf32>
    tpu.vector_store %arg7[%c0_35, %c0_36, %c0_37], %91 {strides = array<i32>} : memref<1x8x256xf32, #tpu.memory_space<vmem>>, vector<1x8x256xf32>,
    return
  }
  func.func @transform_0(%arg0: i32) -> (i32, i32, i32) {
    %c0_i32 = arith.constant 0 : i32
    %c0_i32_0 = arith.constant 0 : i32
    %c0_i32_1 = arith.constant 0 : i32
    return %arg0, %c0_i32, %c0_i32_0 : i32, i32, i32
  }
  func.func @transform_1(%arg0: i32) -> (i32, i32, i32) {
    %c0_i32 = arith.constant 0 : i32
    %c0_i32_0 = arith.constant 0 : i32
    %c0_i32_1 = arith.constant 0 : i32
    return %arg0, %c0_i32, %c0_i32_0 : i32, i32, i32
  }
  func.func @transform_2(%arg0: i32) -> (i32, i32) {
    %c0_i32 = arith.constant 0 : i32
    %c0_i32_0 = arith.constant 0 : i32
    %c0_i32_1 = arith.constant 0 : i32
    return %c0_i32, %c0_i32_0 : i32, i32
  }
  func.func @transform_3(%arg0: i32) -> (i32, i32) {
    %c0_i32 = arith.constant 0 : i32
    %c0_i32_0 = arith.constant 0 : i32
    %c0_i32_1 = arith.constant 0 : i32
    return %c0_i32, %c0_i32_0 : i32, i32
  }
  func.func @transform_4(%arg0: i32) -> (i32, i32) {
    %c0_i32 = arith.constant 0 : i32
    %c0_i32_0 = arith.constant 0 : i32
    %c0_i32_1 = arith.constant 0 : i32
    return %c0_i32, %c0_i32_0 : i32, i32
  }
  func.func @transform_5(%arg0: i32) -> (i32, i32, i32) {
    %c0_i32 = arith.constant 0 : i32
    %c0_i32_0 = arith.constant 0 : i32
    %c0_i32_1 = arith.constant 0 : i32
    return %arg0, %c0_i32, %c0_i32_0 : i32, i32, i32
  }
  func.func @transform_6(%arg0: i32) -> (i32, i32, i32) {
    %c0_i32 = arith.constant 0 : i32
    %c0_i32_0 = arith.constant 0 : i32
    %c0_i32_1 = arith.constant 0 : i32
    return %arg0, %c0_i32, %c0_i32_0 : i32, i32, i32
  }
}

module attributes {stable_mosaic.version = 11 : i64} {
  func.func @convlstm_cell_kernel(%arg0: i32, %arg1: memref<1x16x256xf32, #tpu.memory_space<vmem>>, %arg2: memref<1x8x256xf32, #tpu.memory_space<vmem>>, %arg3: memref<32x144xf32, #tpu.memory_space<vmem>>, %arg4: memref<32x1xf32, #tpu.memory_space<vmem>>, %arg5: memref<9x256xf32, #tpu.memory_space<vmem>>, %arg6: memref<1x8x256xf32, #tpu.memory_space<vmem>>, %arg7: memref<1x8x256xf32, #tpu.memory_space<vmem>>, %arg8: memref<144x256xf32, #tpu.memory_space<vmem>>) attributes {dimension_semantics = [#tpu.dimension_semantics<parallel>], iteration_bounds = array<i64: 2>, scalar_prefetch = 0 : i64, scratch_operands = 1 : i64, tpu.core_type = #tpu.core_type<tc>, window_params = [{transform_indices = @transform_0, window_bounds = array<i64: 1, 16, 256>}, {transform_indices = @transform_1, window_bounds = array<i64: 1, 8, 256>}, {pipeline_mode = #tpu.pipeline_mode<synchronous>, transform_indices = @transform_2, window_bounds = array<i64: 32, 144>}, {pipeline_mode = #tpu.pipeline_mode<synchronous>, transform_indices = @transform_3, window_bounds = array<i64: 32, 1>}, {pipeline_mode = #tpu.pipeline_mode<synchronous>, transform_indices = @transform_4, window_bounds = array<i64: 9, 256>}, {transform_indices = @transform_5, window_bounds = array<i64: 1, 8, 256>}, {transform_indices = @transform_6, window_bounds = array<i64: 1, 8, 256>}]} {
    %c0 = arith.constant 0 : index
    %c0_0 = arith.constant 0 : index
    %c0_1 = arith.constant 0 : index
    %0 = vector.load %arg1[%c0, %c0_0, %c0_1] : memref<1x16x256xf32, #tpu.memory_space<vmem>>, vector<1x16x256xf32>
    %1 = vector.shape_cast %0 : vector<1x16x256xf32> to vector<16x256xf32>
    %c0_2 = arith.constant 0 : index
    %c0_3 = arith.constant 0 : index
    %2 = vector.load %arg5[%c0_2, %c0_3] : memref<9x256xf32, #tpu.memory_space<vmem>>, vector<9x256xf32>
    %c17_i32 = arith.constant 17 : i32
    %3 = tpu.dynamic_rotate %1 by %c17_i32 dim 1 : vector<16x256xf32>, i32 -> vector<16x256xf32>
    %4 = vector.extract_strided_slice %2 {offsets = [0, 0], sizes = [1, 256], strides = [1, 1]} : vector<9x256xf32> to vector<1x256xf32>
    %5 = vector.broadcast %4 : vector<1x256xf32> to vector<16x256xf32>
    %6 = arith.mulf %3, %5 : vector<16x256xf32>
    %c0_4 = arith.constant 0 : index
    %c0_5 = arith.constant 0 : index
    %7 = vector.load %arg8[%c0_4, %c0_5] : memref<144x256xf32, #tpu.memory_space<vmem>>, vector<16x256xf32>
    tpu.vector_store %arg8[%c0_4, %c0_5], %6 {strides = array<i32>} : memref<144x256xf32, #tpu.memory_space<vmem>>, vector<16x256xf32>,
    %c16_i32 = arith.constant 16 : i32
    %8 = tpu.dynamic_rotate %1 by %c16_i32 dim 1 : vector<16x256xf32>, i32 -> vector<16x256xf32>
    %9 = vector.extract_strided_slice %2 {offsets = [1, 0], sizes = [1, 256], strides = [1, 1]} : vector<9x256xf32> to vector<1x256xf32>
    %10 = vector.broadcast %9 : vector<1x256xf32> to vector<16x256xf32>
    %11 = arith.mulf %8, %10 : vector<16x256xf32>
    %c16 = arith.constant 16 : index
    %c0_6 = arith.constant 0 : index
    %12 = vector.load %arg8[%c16, %c0_6] : memref<144x256xf32, #tpu.memory_space<vmem>>, vector<16x256xf32>
    tpu.vector_store %arg8[%c16, %c0_6], %11 {strides = array<i32>} : memref<144x256xf32, #tpu.memory_space<vmem>>, vector<16x256xf32>,
    %c15_i32 = arith.constant 15 : i32
    %13 = tpu.dynamic_rotate %1 by %c15_i32 dim 1 : vector<16x256xf32>, i32 -> vector<16x256xf32>
    %14 = vector.extract_strided_slice %2 {offsets = [2, 0], sizes = [1, 256], strides = [1, 1]} : vector<9x256xf32> to vector<1x256xf32>
    %15 = vector.broadcast %14 : vector<1x256xf32> to vector<16x256xf32>
    %16 = arith.mulf %13, %15 : vector<16x256xf32>
    %c32 = arith.constant 32 : index
    %c0_7 = arith.constant 0 : index
    %17 = vector.load %arg8[%c32, %c0_7] : memref<144x256xf32, #tpu.memory_space<vmem>>, vector<16x256xf32>
    tpu.vector_store %arg8[%c32, %c0_7], %16 {strides = array<i32>} : memref<144x256xf32, #tpu.memory_space<vmem>>, vector<16x256xf32>,
    %c1_i32 = arith.constant 1 : i32
    %18 = tpu.dynamic_rotate %1 by %c1_i32 dim 1 : vector<16x256xf32>, i32 -> vector<16x256xf32>
    %19 = vector.extract_strided_slice %2 {offsets = [3, 0], sizes = [1, 256], strides = [1, 1]} : vector<9x256xf32> to vector<1x256xf32>
    %20 = vector.broadcast %19 : vector<1x256xf32> to vector<16x256xf32>
    %21 = arith.mulf %18, %20 : vector<16x256xf32>
    %c48 = arith.constant 48 : index
    %c0_8 = arith.constant 0 : index
    %22 = vector.load %arg8[%c48, %c0_8] : memref<144x256xf32, #tpu.memory_space<vmem>>, vector<16x256xf32>
    tpu.vector_store %arg8[%c48, %c0_8], %21 {strides = array<i32>} : memref<144x256xf32, #tpu.memory_space<vmem>>, vector<16x256xf32>,
    %23 = vector.extract_strided_slice %2 {offsets = [4, 0], sizes = [1, 256], strides = [1, 1]} : vector<9x256xf32> to vector<1x256xf32>
    %24 = vector.broadcast %23 : vector<1x256xf32> to vector<16x256xf32>
    %25 = arith.mulf %1, %24 : vector<16x256xf32>
    %c64 = arith.constant 64 : index
    %c0_9 = arith.constant 0 : index
    %26 = vector.load %arg8[%c64, %c0_9] : memref<144x256xf32, #tpu.memory_space<vmem>>, vector<16x256xf32>
    tpu.vector_store %arg8[%c64, %c0_9], %25 {strides = array<i32>} : memref<144x256xf32, #tpu.memory_space<vmem>>, vector<16x256xf32>,
    %c255_i32 = arith.constant 255 : i32
    %27 = tpu.dynamic_rotate %1 by %c255_i32 dim 1 : vector<16x256xf32>, i32 -> vector<16x256xf32>
    %28 = vector.extract_strided_slice %2 {offsets = [5, 0], sizes = [1, 256], strides = [1, 1]} : vector<9x256xf32> to vector<1x256xf32>
    %29 = vector.broadcast %28 : vector<1x256xf32> to vector<16x256xf32>
    %30 = arith.mulf %27, %29 : vector<16x256xf32>
    %c80 = arith.constant 80 : index
    %c0_10 = arith.constant 0 : index
    %31 = vector.load %arg8[%c80, %c0_10] : memref<144x256xf32, #tpu.memory_space<vmem>>, vector<16x256xf32>
    tpu.vector_store %arg8[%c80, %c0_10], %30 {strides = array<i32>} : memref<144x256xf32, #tpu.memory_space<vmem>>, vector<16x256xf32>,
    %c241_i32 = arith.constant 241 : i32
    %32 = tpu.dynamic_rotate %1 by %c241_i32 dim 1 : vector<16x256xf32>, i32 -> vector<16x256xf32>
    %33 = vector.extract_strided_slice %2 {offsets = [6, 0], sizes = [1, 256], strides = [1, 1]} : vector<9x256xf32> to vector<1x256xf32>
    %34 = vector.broadcast %33 : vector<1x256xf32> to vector<16x256xf32>
    %35 = arith.mulf %32, %34 : vector<16x256xf32>
    %c96 = arith.constant 96 : index
    %c0_11 = arith.constant 0 : index
    %36 = vector.load %arg8[%c96, %c0_11] : memref<144x256xf32, #tpu.memory_space<vmem>>, vector<16x256xf32>
    tpu.vector_store %arg8[%c96, %c0_11], %35 {strides = array<i32>} : memref<144x256xf32, #tpu.memory_space<vmem>>, vector<16x256xf32>,
    %c240_i32 = arith.constant 240 : i32
    %37 = tpu.dynamic_rotate %1 by %c240_i32 dim 1 : vector<16x256xf32>, i32 -> vector<16x256xf32>
    %38 = vector.extract_strided_slice %2 {offsets = [7, 0], sizes = [1, 256], strides = [1, 1]} : vector<9x256xf32> to vector<1x256xf32>
    %39 = vector.broadcast %38 : vector<1x256xf32> to vector<16x256xf32>
    %40 = arith.mulf %37, %39 : vector<16x256xf32>
    %c112 = arith.constant 112 : index
    %c0_12 = arith.constant 0 : index
    %41 = vector.load %arg8[%c112, %c0_12] : memref<144x256xf32, #tpu.memory_space<vmem>>, vector<16x256xf32>
    tpu.vector_store %arg8[%c112, %c0_12], %40 {strides = array<i32>} : memref<144x256xf32, #tpu.memory_space<vmem>>, vector<16x256xf32>,
    %c239_i32 = arith.constant 239 : i32
    %42 = tpu.dynamic_rotate %1 by %c239_i32 dim 1 : vector<16x256xf32>, i32 -> vector<16x256xf32>
    %43 = vector.extract_strided_slice %2 {offsets = [8, 0], sizes = [1, 256], strides = [1, 1]} : vector<9x256xf32> to vector<1x256xf32>
    %44 = vector.broadcast %43 : vector<1x256xf32> to vector<16x256xf32>
    %45 = arith.mulf %42, %44 : vector<16x256xf32>
    %c128 = arith.constant 128 : index
    %c0_13 = arith.constant 0 : index
    %46 = vector.load %arg8[%c128, %c0_13] : memref<144x256xf32, #tpu.memory_space<vmem>>, vector<16x256xf32>
    tpu.vector_store %arg8[%c128, %c0_13], %45 {strides = array<i32>} : memref<144x256xf32, #tpu.memory_space<vmem>>, vector<16x256xf32>,
    %c0_14 = arith.constant 0 : index
    %c0_15 = arith.constant 0 : index
    %47 = vector.load %arg3[%c0_14, %c0_15] : memref<32x144xf32, #tpu.memory_space<vmem>>, vector<32x144xf32>
    %c0_16 = arith.constant 0 : index
    %c0_17 = arith.constant 0 : index
    %48 = vector.load %arg8[%c0_16, %c0_17] : memref<144x256xf32, #tpu.memory_space<vmem>>, vector<144x256xf32>
    %cst = arith.constant dense<0.000000e+00> : vector<32x256xf32>
    %49 = tpu.matmul %47, %48, %cst {dimension_numbers = #tpu.dot_dimension_numbers<[1], [0], [0], [1], [0, 0, 1, 1], [], []>} : vector<32x144xf32>, vector<144x256xf32>, vector<32x256xf32> -> vector<32x256xf32>
    %c0_18 = arith.constant 0 : index
    %c0_19 = arith.constant 0 : index
    %50 = vector.load %arg4[%c0_18, %c0_19] : memref<32x1xf32, #tpu.memory_space<vmem>>, vector<32x1xf32>
    %51 = vector.broadcast %50 : vector<32x1xf32> to vector<32x256xf32>
    %52 = arith.addf %49, %51 : vector<32x256xf32>
    %53 = vector.extract_strided_slice %52 {offsets = [0, 0], sizes = [8, 256], strides = [1, 1]} : vector<32x256xf32> to vector<8x256xf32>
    %cst_20 = arith.constant 5.000000e-01 : f32
    %54 = vector.broadcast %cst_20 : f32 to vector<8x256xf32>
    %55 = arith.mulf %54, %53 : vector<8x256xf32>
    %56 = math.tanh %55 : vector<8x256xf32>
    %cst_21 = arith.constant 5.000000e-01 : f32
    %57 = vector.broadcast %cst_21 : f32 to vector<8x256xf32>
    %58 = arith.mulf %57, %56 : vector<8x256xf32>
    %cst_22 = arith.constant 5.000000e-01 : f32
    %59 = vector.broadcast %cst_22 : f32 to vector<8x256xf32>
    %60 = arith.addf %58, %59 : vector<8x256xf32>
    %61 = vector.extract_strided_slice %52 {offsets = [8, 0], sizes = [8, 256], strides = [1, 1]} : vector<32x256xf32> to vector<8x256xf32>
    %cst_23 = arith.constant 5.000000e-01 : f32
    %62 = vector.broadcast %cst_23 : f32 to vector<8x256xf32>
    %63 = arith.mulf %62, %61 : vector<8x256xf32>
    %64 = math.tanh %63 : vector<8x256xf32>
    %cst_24 = arith.constant 5.000000e-01 : f32
    %65 = vector.broadcast %cst_24 : f32 to vector<8x256xf32>
    %66 = arith.mulf %65, %64 : vector<8x256xf32>
    %cst_25 = arith.constant 5.000000e-01 : f32
    %67 = vector.broadcast %cst_25 : f32 to vector<8x256xf32>
    %68 = arith.addf %66, %67 : vector<8x256xf32>
    %69 = vector.extract_strided_slice %52 {offsets = [16, 0], sizes = [8, 256], strides = [1, 1]} : vector<32x256xf32> to vector<8x256xf32>
    %70 = math.tanh %69 : vector<8x256xf32>
    %71 = vector.extract_strided_slice %52 {offsets = [24, 0], sizes = [8, 256], strides = [1, 1]} : vector<32x256xf32> to vector<8x256xf32>
    %cst_26 = arith.constant 5.000000e-01 : f32
    %72 = vector.broadcast %cst_26 : f32 to vector<8x256xf32>
    %73 = arith.mulf %72, %71 : vector<8x256xf32>
    %74 = math.tanh %73 : vector<8x256xf32>
    %cst_27 = arith.constant 5.000000e-01 : f32
    %75 = vector.broadcast %cst_27 : f32 to vector<8x256xf32>
    %76 = arith.mulf %75, %74 : vector<8x256xf32>
    %cst_28 = arith.constant 5.000000e-01 : f32
    %77 = vector.broadcast %cst_28 : f32 to vector<8x256xf32>
    %78 = arith.addf %76, %77 : vector<8x256xf32>
    %c0_29 = arith.constant 0 : index
    %c0_30 = arith.constant 0 : index
    %c0_31 = arith.constant 0 : index
    %79 = vector.load %arg2[%c0_29, %c0_30, %c0_31] : memref<1x8x256xf32, #tpu.memory_space<vmem>>, vector<1x8x256xf32>
    %80 = vector.shape_cast %79 : vector<1x8x256xf32> to vector<8x256xf32>
    %81 = arith.mulf %68, %80 : vector<8x256xf32>
    %82 = arith.mulf %60, %70 : vector<8x256xf32>
    %83 = arith.addf %81, %82 : vector<8x256xf32>
    %84 = math.tanh %83 : vector<8x256xf32>
    %85 = arith.mulf %78, %84 : vector<8x256xf32>
    %c0_32 = arith.constant 0 : index
    %c0_33 = arith.constant 0 : index
    %c0_34 = arith.constant 0 : index
    %86 = vector.load %arg6[%c0_32, %c0_33, %c0_34] : memref<1x8x256xf32, #tpu.memory_space<vmem>>, vector<1x8x256xf32>
    %87 = vector.shape_cast %86 : vector<1x8x256xf32> to vector<8x256xf32>
    %88 = vector.shape_cast %85 : vector<8x256xf32> to vector<1x8x256xf32>
    tpu.vector_store %arg6[%c0_32, %c0_33, %c0_34], %88 {strides = array<i32>} : memref<1x8x256xf32, #tpu.memory_space<vmem>>, vector<1x8x256xf32>,
    %c0_35 = arith.constant 0 : index
    %c0_36 = arith.constant 0 : index
    %c0_37 = arith.constant 0 : index
    %89 = vector.load %arg7[%c0_35, %c0_36, %c0_37] : memref<1x8x256xf32, #tpu.memory_space<vmem>>, vector<1x8x256xf32>
    %90 = vector.shape_cast %89 : vector<1x8x256xf32> to vector<8x256xf32>
    %91 = vector.shape_cast %83 : vector<8x256xf32> to vector<1x8x256xf32>
    tpu.vector_store %arg7[%c0_35, %c0_36, %c0_37], %91 {strides = array<i32>} : memref<1x8x256xf32, #tpu.memory_space<vmem>>, vector<1x8x256xf32>,
    return
  }
  func.func @transform_0(%arg0: i32) -> (i32, i32, i32) {
    %c0_i32 = arith.constant 0 : i32
    %c0_i32_0 = arith.constant 0 : i32
    %c0_i32_1 = arith.constant 0 : i32
    return %arg0, %c0_i32, %c0_i32_0 : i32, i32, i32
  }
  func.func @transform_1(%arg0: i32) -> (i32, i32, i32) {
    %c0_i32 = arith.constant 0 : i32
    %c0_i32_0 = arith.constant 0 : i32
    %c0_i32_1 = arith.constant 0 : i32
    return %arg0, %c0_i32, %c0_i32_0 : i32, i32, i32
  }
  func.func @transform_2(%arg0: i32) -> (i32, i32) {
    %c0_i32 = arith.constant 0 : i32
    %c0_i32_0 = arith.constant 0 : i32
    %c0_i32_1 = arith.constant 0 : i32
    return %c0_i32, %c0_i32_0 : i32, i32
  }
  func.func @transform_3(%arg0: i32) -> (i32, i32) {
    %c0_i32 = arith.constant 0 : i32
    %c0_i32_0 = arith.constant 0 : i32
    %c0_i32_1 = arith.constant 0 : i32
    return %c0_i32, %c0_i32_0 : i32, i32
  }
  func.func @transform_4(%arg0: i32) -> (i32, i32) {
    %c0_i32 = arith.constant 0 : i32
    %c0_i32_0 = arith.constant 0 : i32
    %c0_i32_1 = arith.constant 0 : i32
    return %c0_i32, %c0_i32_0 : i32, i32
  }
  func.func @transform_5(%arg0: i32) -> (i32, i32, i32) {
    %c0_i32 = arith.constant 0 : i32
    %c0_i32_0 = arith.constant 0 : i32
    %c0_i32_1 = arith.constant 0 : i32
    return %arg0, %c0_i32, %c0_i32_0 : i32, i32, i32
  }
  func.func @transform_6(%arg0: i32) -> (i32, i32, i32) {
    %c0_i32 = arith.constant 0 : i32
    %c0_i32_0 = arith.constant 0 : i32
    %c0_i32_1 = arith.constant 0 : i32
    return %arg0, %c0_i32, %c0_i32_0 : i32, i32, i32
  }
}

</mosaic_0001>

<bundles_post_ra>
// kernel: tpu_custom_call.1
= control target key start
LH: loop header
LB: loop body
LE: loop exit
PB: predicated region body
PF: predicated region fallthrough
CT: control target
= control target key end

     0   :  { %12 = vsyncpa [#allocation4], 0  ;;  %s1748_s0 = inlined_call_operand.hbm [shape: f32[2,16,256], index: 0, kind: input, shape index: {}]   ;;  %s1749_s1 = inlined_call_operand.vmem [shape: f32[2,8,256], index: 1, kind: input, shape index: {}]   ;;  %s1750_s2 = inlined_call_operand.hbm [shape: f32[32,144], index: 2, kind: input, shape index: {}]   ;;  %s1751_s3 = inlined_call_operand.vmem [shape: f32[32,1], index: 3, kind: input, shape index: {}]   ;;  %s1752_s4 = inlined_call_operand.hbm [shape: f32[9,256], index: 4, kind: input, shape index: {}]   ;;  %s1753_s5 = inlined_call_operand.hbm [shape: f32[2,8,256], index: 5, kind: output, shape index: {0}]   ;;  %s1754_s6 = inlined_call_operand.hbm [shape: f32[2,8,256], index: 6, kind: output, shape index: {1}]  }
   0x1   :  { %14 = vsyncpa [#allocation4 + $0x1], 0 }
   0x2   :  { %15 = vsyncpa [#allocation7], 0 }
   0x3   :  { %16 = vsyncpa [#allocation5], 0 }
   0x4   :  { %18 = vsyncpa [#allocation5 + $0x1], 0 }
   0x5   :  { %19 = vsyncpa [#allocation11], 0 }
   0x6   :  { %21 = vsyncpa [#allocation11 + $0x1], 0  ;;  %s1373_s21 = smov 0   ;;  %s1375_s22 = smov 0  }
   0x7   :  { %s1377_s23 = smov 0   ;;  %s1379_s24 = smov 0  }
   0x8 LB: > { %s1394_s25 = sadd.s32 4294967295, %s1320_s24   ;;  %s967_s26 = sadd.s32 4294967294, %s1320_s24   ;;  %s1320_s24 = sphi %s1379_s24, %s1779_s24   ;;  %s1316_s23 = sphi %s1377_s23, %s1778_s23   ;;  %s1312_s22 = sphi %s1375_s22, %s1777_s22   ;;  %s1308_s21 = sphi %s1373_s21, %s1776_s21  }
   0x9   : > { %p47_p0 = scmp.ne.s32.totalorder %s1312_s22, %s1308_s21  ;;  %p1755_p1 = scmp.eq.s32.totalorder %s1394_s25, 0 }
   0xa   : > { %p160_p2 = scmp.eq.s32.totalorder %s1394_s25, 1  ;;  %p166_p3 = scmp.eq.s32.totalorder %s967_s26, 1 }
   0xb   : > { %p1403_p4 = por %p1755_p1, %p47_p0  ;;  %p968_p5 = scmp.ge.s32.totalorder %s1320_s24, 1 }
   0xc   : > { %p1408_p6 = por %p166_p3, %p47_p0  ;;  %p199_p7 = scmp.lt.s32.totalorder %s1320_s24, 3 }
   0xd   : > { %s1761_s27 = scalar_select %p1403_p4, 1, 0 }
   0xe   : > { %s1762_s28 = scalar_select %p1408_p6, 1, 0 }
   0xf   : > { %p1413_p8 = pnand %p968_p5, %p199_p7  ;;  %s1322_s30 = smov [#allocation6]  }
  0x10   : > { %s211_s7 = sshll.u32 %s1322_s30, 4  ;;  %s1323_s9 = smov [#allocation8]   ;;  %s212_s7 = int_to_ptr.vmem [resolvable:$true] %s211_s7 }
  0x11   : > { %s1763_s29 = scalar_select %p1413_p8, 1, 0 }
  0x12   : > { %p1051_p9 = pneg %p1413_p8  ;;  %s227_s10 = sshll.u32 %s1323_s9, 4  ;;  %s228_s10 = int_to_ptr.vmem [resolvable:$true] %s227_s10 }
  0x13   : > { %s1153_s11 = scalar_lea.vmem %s212_s7, 1024  ;;  %p1161_p5 = scmp.lt.s32.totalorder %s212_s7, %s212_s7 }
  0x14   : > { %p1422_p11 = pnand %p1051_p9, %p1755_p1  ;;  %p1154_p13 = scmp.ne.s32.totalorder %s212_s7, %s1153_s11 }
  0x15   : > { %p1162_p7 = scmp.lt.s32.totalorder %s1153_s11, %s1153_s11 }
  0x16   : > { %p1144_p12 = pneg %p1422_p11 }
  0x17   : > { %p1163_p10 = por %p1162_p7, %p1161_p5 }
  0x18   : > { %p1156_p0 = pnand %p1154_p13, %p1144_p12 }
  0x1a   : > { %p1157_p3 = pneg %p1156_p0 }
  0x1c   : > { %p1164_p9 = pnand %p1163_p10, %p1157_p3 }
  0x1e   : > { %1167 = shalt.err (!%p1164_p9)
}
  0x1f   : > { %s1756_s12 = smov 256   ;;  %s1757_s13 = smov 16  }
  0x20   : > { %1054 = dma.hbm_to_vmem [thread:$0]  (!%p1422_p11), %s1750_s2, 1024, %s212_s7, [#allocation7], %s1756_s12, %s1756_s12, %s1757_s13  }
  0x21   : > { %s1179_s16 = scalar_lea.vmem %s228_s10, 512  ;;  %p1187_p10 = scmp.lt.s32.totalorder %s228_s10, %s228_s10 }
  0x22   : > { %p1180_p13 = scmp.ne.s32.totalorder %s228_s10, %s1179_s16  ;;  %p1188_p3 = scmp.lt.s32.totalorder %s1179_s16, %s1179_s16 }
  0x24   : > { %p1182_p0 = pnand %p1180_p13, %p1144_p12  ;;  %p1189_p7 = por %p1188_p3, %p1187_p10 }
  0x26   : > { %p1183_p5 = pneg %p1182_p0 }
  0x28   : > { %p1190_p9 = pnand %p1189_p7, %p1183_p5 }
  0x2a   : > { %1193 = shalt.err (!%p1190_p9)
}
  0x2b   : > { %1057 = dma.hbm_to_vmem [thread:$0]  (!%p1422_p11), %s1752_s4, 512, %s228_s10, [#allocation7], %s1756_s12, %s1756_s12, %s1757_s13  }
  0x2c   : > { %s1451_s19 = sadd.s32 1, %s1320_s24   ;;  %s34_s20 = sadd.s32 1, %s1316_s23 }
  0x2d   : > { %s31_s26 = ssub.s32 %s1320_s24, %s1451_s19  ;;  %p41_p12 = scmp.ne.s32.totalorder %s1316_s23, %s1312_s22 }
  0x2e   : > { %p32_p13 = scmp.eq.s32.totalorder %s31_s26, 0  ;;  %p42_p0 = scmp.eq.s32.totalorder %s1320_s24, 0 }
  0x2f   : > { %p1461_p5 = por %p160_p2, %p41_p12  ;;  %p1071_p10 = scmp.lt.s32.totalorder %s1320_s24, 2 }
  0x30   : > { %s1467_s7 = scalar_select %p32_p13, %s1316_s23, %s34_s20  }
  0x31   : > { %s1765_s30 = scalar_select %p1461_p5, 1, 0 }
  0x32   : > { %p43_p3 = por %p42_p0, %p41_p12  ;;  %s241_s8 = sand.u32 1, %s1316_s23  }
  0x33   : > { %s972_s9 = sshll.u32 %s241_s8, 5  ;;  %s997_s10 = sshll.u32 %s1320_s24, 9 }
  0x34   : > { %s1474_s15 = scalar_lea.hbm %s1748_s0, %s997_s10  ;;  %s245_s16 = scalar_lea.vmem [#allocation3], %s972_s9 }
  0x35   : > { %s252_s17 = sshll.u32 %s245_s16, 4  ;;  %p1478_p2 = pnand %p1071_p10, %p43_p3  ;;  %s1476_s17 = int_to_ptr.vmem [resolvable:$true] %s252_s17 }
  0x36   : > { %s1482_s20 = scalar_lea.sflag [#allocation4], %s241_s8  ;;  %s1194_s26 = scalar_lea.hbm %s1474_s15, 512 }
  0x37   : > { %p1195_p11 = scmp.ne.s32.totalorder %s1474_s15, %s1194_s26  ;;  %p1196_p7 = pneg %p1478_p2 }
  0x38   : > { %s1199_s9 = scalar_lea.hbm %s1748_s0, 1024  ;;  %p1200_p13 = scmp.lt.s32.totalorder %s1474_s15, %s1748_s0 }
  0x39   : > { %p1197_p9 = pnand %p1196_p7, %p1195_p11  ;;  %p1201_p0 = scmp.lt.s32.totalorder %s1199_s9, %s1194_s26 }
  0x3b   : > { %p1198_p12 = pneg %p1197_p9  ;;  %p1202_p10 = por %p1201_p0, %p1200_p13 }
  0x3d   : > { %p1203_p3 = pnand %p1202_p10, %p1198_p12 }
  0x3f   : > { %1206 = shalt.err (!%p1203_p3)
}
  0x40   : > { %s1207_s8 = scalar_lea.vmem %s1476_s17, 512  ;;  %s1326_s12 = smov [#allocation3]  }
  0x41   : > { %p1208_p1 = scmp.ne.s32.totalorder %s1476_s17, %s1207_s8  ;;  %s1212_s13 = sshll.u32 %s1326_s12, 4  ;;  %s1213_s13 = int_to_ptr.vmem [resolvable:$false] %s1212_s13 }
  0x42   : > { %s1214_s10 = scalar_lea.vmem %s1213_s13, 1024  ;;  %p1215_p9 = scmp.lt.s32.totalorder %s1476_s17, %s1213_s13 }
  0x43   : > { %p1210_p6 = pnand %p1208_p1, %p1196_p7  ;;  %p1216_p5 = scmp.lt.s32.totalorder %s1214_s10, %s1207_s8 }
  0x45   : > { %p1211_p11 = pneg %p1210_p6  ;;  %p1217_p4 = por %p1216_p5, %p1215_p9 }
  0x47   : > { %p1218_p8 = pnand %p1217_p4, %p1211_p11 }
  0x49   : > { %1221 = shalt.err (!%p1218_p8)
}
  0x4a   : > { %s1767_s26 = smov 16   ;;  %s1768_s11 = smov 256  }
  0x4b   : > { %1061 = dma.hbm_to_vmem [thread:$0]  (!%p1478_p2), %s1474_s15, 512, %s1476_s17, %s1482_s20, %s1768_s11, %s1768_s11, %s1767_s26  }
  0x4c   : > { %p1769_p1 = scmp.ne.s32.totalorder %s1763_s29, 0 }
  0x4d   : > { %s1509_s12 = sand.u32 (!%p1769_p1), 1, %s1312_s22   ;;  %p1770_p4 = scmp.ne.s32.totalorder (!%p1769_p1), %s1761_s27, 0 }
  0x4e   : > { %272 = sbr.rel (%p1769_p1) target bundleno = 529 (0x211), region = 40  ;;  %s976_s13 = sshll.u32 (!%p1769_p1), %s1509_s12, 5 }
  0x4f   : > { %s275_s9 = scalar_lea.sflag (!%p1769_p1), [#allocation4], %s1509_s12  ;;  %s278_s14 = scalar_lea.vmem (!%p1769_p1), [#allocation3], %s976_s13 }
  0x53   : > { %1291 = dma.done.wait (%p1770_p4), %s275_s9, 512  }
  0x54   : > { %1293 = vsyncadd (%p1770_p4), %s275_s9, 4294966784  ;;  %p1771_p6 = scmp.eq.s32.totalorder %s1394_s25, 0 }
  0x56   : > { %1295 = dma.done.wait (%p1771_p6), [#allocation7], 1536   ;;  %p1772_p8 = pmov %p1771_p6 }
  0x57   : > { %v1521_v0 = vld [vmem:[%s278_s14 + $0x10] sm:$0xff]  ;;  %v1523_v1 = vld [vmem:[%s278_s14] sm:$0xff]  ;;  %s1327_s29 = smov 112   ;;  %v1527_v2 = vld [vmem:[%s278_s14 + $0x18] sm:$0xff]  ;;  %s1328_s27 = smov 113   ;;  %vm656_vm0 = vcmask 130048   ;;  %v346_v11 = vlaneseq }
  0x58   : > { %1297 = vsyncadd (%p1772_p8), [#allocation7], 4294965760  ;;  %532 = vrot.lane.b32.xlu0 %v1521_v0, %s1327_s29  ;;  %530 = vrot.lane.b32.xlu1 %v1523_v1, %s1327_s29  ;;  %v1529_v3 = vld [vmem:[%s278_s14 + $0x8] sm:$0xff]  ;;  %s1329_s15 = smov 127   ;;  %s1330_s17 = smov 1   ;;  %v1335_v6 = vmov 0  }
  0x59   : > { %s1331_s18 = smov 15   ;;  %s1332_s20 = smov 16   ;;  %v589_v4 = vld [vmem:[#allocation6 + $0x8] sm:$0xff]  ;;  %1120 = vset.pattern.permute.xlu0 %v1335_v6  ;;  %1121 = vset.pattern.permute.xlu1 %v1335_v6  ;;  %v632_v7 = vld [vmem:[%s1751_s3] sm:$0xff]  ;;  %v635_v9 = vld [vmem:[%s1751_s3 + $0x18] sm:$0xff]  ;;  %v1575_v12 = vshrl.u32 %v346_v11, 7 }
  0x5a   : > { %s1333_s16 = smov 17   ;;  %v593_v5 = vld [vmem:[#allocation6 + $0x28] sm:$0xff]  ;;  %985 = vmatprep.mubr.msk.f32.mxu0 %vm656_vm0, %v589_v4  ;;  %s1334_s8 = smov 111   ;;  %v634_v10 = vld [vmem:[%s1751_s3 + $0x10] sm:$0xff]  ;;  %v1577_v13 = vand.u32 127, %v346_v11  ;;  %v1580_v15 = vld [vmem:[#allocation8] sm:$0xff] }
  0x5b   : > { %987 = vmatprep.mubr.msk.f32.mxu1 %vm656_vm0, %v593_v5  ;;  %v633_v8 = vld [vmem:[%s1751_s3 + $0x8] sm:$0xff]  ;;  %v545_v14 = vsub.s32 7, %v1575_v12  ;;  %v516_v19 = vsub.s32 6, %v1575_v12  ;;  %v487_v38 = vsub.s32 5, %v1575_v12  ;;  %v458_v49 = vsub.s32 4, %v1575_v12  ;;  %p325_p5 = scmp.lt.s32.totalorder %s1394_s25, 1 }
  0x5c   : > { %536 = vrot.lane.b32.xlu0 %v1527_v2, %s1327_s29  ;;  %534 = vrot.lane.b32.xlu1 %v1529_v3, %s1327_s29  ;;  %v1582_v16 = vld [vmem:[#allocation8 + $0x8] sm:$0xff]  ;;  %vm538_vm1 = vcmp.lt.s32.totalorder %v1577_v13, 112  ;;  %vm509_vm2 = vcmp.lt.s32.totalorder %v1577_v13, 113  ;;  %vm480_vm3 = vcmp.lt.s32.totalorder %v1577_v13, 127  ;;  %v442_v60 = vsub.s32 3, %v1575_v12  ;;  %s999_s10 = sshll.u32 %s1394_s25, 8 }
  0x5d   : > { %v546_v20 = vrot.slane %v1580_v15, %v545_v14  ;;  %v550_v21 = vrot.slane %v1582_v16, %v545_v14  ;;  %v517_v27 = vrot.slane %v1580_v15, %v516_v19  ;;  %v521_v30 = vrot.slane %v1582_v16, %v516_v19  ;;  %s1691_s14 = scalar_lea.hbm %s1754_s6, %s999_s10  ;;  %s806_s29 = scalar_lea.sflag [#allocation11], %s1509_s12 }
  0x5e   : > { %v488_v45 = vrot.slane %v1580_v15, %v487_v38  ;;  %v492_v48 = vrot.slane %v1582_v16, %v487_v38  ;;  %v463_v56 = vrot.slane %v1582_v16, %v458_v49  ;;  %v459_v57 = vrot.slane %v1580_v15, %v458_v49  ;;  %p1773_p7 = scmp.ne.s32.totalorder %s1765_s30, 0 }
  0x5f   : > { %vm435_vm4 = vcmp.lt.s32.totalorder %v1577_v13, 1  ;;  %v413_v11 = vsub.s32 2, %v1575_v12  ;;  %v443_v14 = vrot.slane %v1580_v15, %v442_v60  ;;  %vm406_vm5 = vcmp.lt.s32.totalorder %v1577_v13, 15 }
  0x60   : > { %503 = vrot.lane.b32.xlu0 %v1521_v0, %s1328_s27  ;;  %507 = vrot.lane.b32.xlu1 %v1527_v2, %s1328_s27  ;;  %v467_v5 = vmul.f32 %v463_v56, %v1527_v2  ;;  %v466_v6 = vmul.f32 %v459_v57, %v1521_v0  ;;  %vm377_vm6 = vcmp.lt.s32.totalorder %v1577_v13, 16  ;;  %vm348_vm7 = vcmp.lt.s32.totalorder %v1577_v13, 17 }
  0x61   : > { %vm567_vm8 = vcmp.lt.s32.totalorder %v1577_v13, 111  ;;  %v590_v13 = vld [vmem:[#allocation6 + $0x10] sm:$0xff] }
  0x64   : > { %501 = vrot.lane.b32.xlu0 %v1523_v1, %s1328_s27  ;;  %505 = vrot.lane.b32.xlu1 %v1529_v3, %s1328_s27 }
  0x68   : > { %474 = vrot.lane.b32.xlu0 %v1521_v0, %s1329_s15  ;;  %478 = vrot.lane.b32.xlu1 %v1527_v2, %s1329_s15 }
  0x6c   : > { %472 = vrot.lane.b32.xlu0 %v1523_v1, %s1329_s15  ;;  %476 = vrot.lane.b32.xlu1 %v1529_v3, %s1329_s15  ;;  %s326_s15 = scalar_select %p325_p5, %s1394_s25, 1 }
  0x70   : > { %429 = vrot.lane.b32.xlu0 %v1521_v0, %s1330_s17  ;;  %433 = vrot.lane.b32.xlu1 %v1527_v2, %s1330_s17 }
  0x74   : > { %427 = vrot.lane.b32.xlu0 %v1523_v1, %s1330_s17  ;;  %431 = vrot.lane.b32.xlu1 %v1529_v3, %s1330_s17  ;;  %s998_s17 = sshll.u32 %s326_s15, 4  ;;  %s1336_s15 = smov [#allocation10]  }
  0x78   : > { %400 = vrot.lane.b32.xlu0 %v1521_v0, %s1331_s18  ;;  %404 = vrot.lane.b32.xlu1 %v1527_v2, %s1331_s18 }
  0x7c   : > { %398 = vrot.lane.b32.xlu0 %v1523_v1, %s1331_s18  ;;  %402 = vrot.lane.b32.xlu1 %v1529_v3, %s1331_s18 }
  0x80   : > { %371 = vrot.lane.b32.xlu0 %v1521_v0, %s1332_s20  ;;  %375 = vrot.lane.b32.xlu1 %v1527_v2, %s1332_s20 }
  0x84   : > { %369 = vrot.lane.b32.xlu0 %v1523_v1, %s1332_s20  ;;  %373 = vrot.lane.b32.xlu1 %v1529_v3, %s1332_s20 }
  0x88   : > { %340 = vrot.lane.b32.xlu0 %v1521_v0, %s1333_s16  ;;  %344 = vrot.lane.b32.xlu1 %v1527_v2, %s1333_s16 }
  0x8c   : > { %338 = vrot.lane.b32.xlu0 %v1523_v1, %s1333_s16  ;;  %342 = vrot.lane.b32.xlu1 %v1529_v3, %s1333_s16  ;;  %s329_s16 = scalar_lea.vmem %s1749_s1, %s998_s17  ;;  %s1226_s17 = sshll.u32 %s1336_s15, 4  ;;  %s1227_s17 = int_to_ptr.vmem [resolvable:$false] %s1226_s17 }
  0x8d   : > { %s1228_s18 = scalar_lea.vmem %s1227_s17, 512 }
  0x90   : > { %561 = vrot.lane.b32.xlu0 %v1521_v0, %s1334_s8  ;;  %565 = vrot.lane.b32.xlu1 %v1527_v2, %s1334_s8  ;;  %v464_v2 = vmul.f32 %v459_v57, %v1523_v1 }
  0x94   : > { %559 = vrot.lane.b32.xlu0 %v1523_v1, %s1334_s8  ;;  %563 = vrot.lane.b32.xlu1 %v1529_v3, %s1334_s8  ;;  %s979_s8 = sshll.u32 %s1509_s12, 4 }
  0x95   : > { %s324_s26 = scalar_lea.vmem [#allocation10], %s979_s8 }
  0x96   : > { %s834_s11 = sshll.u32 %s324_s26, 4  ;;  %s835_s11 = int_to_ptr.vmem [resolvable:$true] %s834_s11 }
  0x97   : > { %s1222_s27 = scalar_lea.vmem %s835_s11, 256  ;;  %p1229_p0 = scmp.lt.s32.totalorder %s835_s11, %s1227_s17 }
  0x98   : > { %638 = vperm.xlu0 %1120, %v632_v7   ;;  %643 = vperm.xlu1 %1121, %v633_v8   ;;  %v447_v8 = vrot.slane %v1582_v16, %v442_v60  ;;  %p1223_p2 = scmp.ne.s32.totalorder %s835_s11, %s1222_s27  ;;  %p1230_p10 = scmp.lt.s32.totalorder %s1228_s18, %s1222_s27 }
  0x9a   : > { %p1224_p12 = pnand %p1223_p2, %p1773_p7  ;;  %p1231_p3 = por %p1230_p10, %p1229_p0 }
  0x9c   : > { %653 = vperm.xlu0 %1120, %v635_v9   ;;  %648 = vperm.xlu1 %1121, %v634_v10   ;;  %v465_v10 = vmul.f32 %v463_v56, %v1529_v3  ;;  %p1225_p13 = pneg %p1224_p12 }
  0x9e   : > { %p1232_p11 = pnand %p1231_p3, %p1225_p13 }
  0xca   : > { %v533_v17 = vpop.permute.xlu0 %532  ;;  %v531_v18 = vpop.permute.xlu1 %530 }
  0xce   : > { %v537_v22 = vpop.permute.xlu0 %536  ;;  %v535_v23 = vpop.permute.xlu1 %534 }
  0xcf   : > { %v540_v24 = vsel %vm538_vm1, %v533_v17, %v537_v22  ;;  %v542_v25 = vsel %vm538_vm1, %v537_v22, %v533_v17  ;;  %v541_v26 = vsel %vm538_vm1, %v535_v23, %v531_v18  ;;  %v539_v28 = vsel %vm538_vm1, %v531_v18, %v535_v23 }
  0xd0   : > { %v554_v29 = vmul.f32 %v550_v21, %v542_v25  ;;  %v553_v31 = vmul.f32 %v546_v20, %v540_v24  ;;  %v552_v32 = vmul.f32 %v550_v21, %v541_v26  ;;  %v551_v35 = vmul.f32 %v546_v20, %v539_v28 }
  0xd1   : > { %v414_v20 = vrot.slane %v1580_v15, %v413_v11  ;;  %v418_v25 = vrot.slane %v1582_v16, %v413_v11 }
  0xd2   : > { %669 = vmatprep.subr.mxu0 %v554_v29  ;;  %1001 = vmatprep.subr.mxu1 %v554_v29  ;;  %v504_v33 = vpop.permute.xlu0 %503  ;;  %v508_v34 = vpop.permute.xlu1 %507 }
  0xd3   : > { %v511_v36 = vsel %vm509_vm2, %v504_v33, %v508_v34  ;;  %v513_v37 = vsel %vm509_vm2, %v508_v34, %v504_v33  ;;  %670 = vmatpush1.msra.mxu0 %v553_v31  ;;  %1019 = vmatpush1.msra.mxu1 %v553_v31 }
  0xd4   : > { %v524_v39 = vmul.f32 %v517_v27, %v511_v36  ;;  %v525_v40 = vmul.f32 %v521_v30, %v513_v37  ;;  %671 = vmatprep.subr.mxu0 %v552_v32  ;;  %1002 = vmatprep.subr.mxu1 %v552_v32  ;;  %v384_v32 = vsub.s32 1, %v1575_v12 }
  0xd5   : > { %672 = vmatpush1.msra.mxu0 %v551_v35  ;;  %1020 = vmatpush1.msra.mxu1 %v551_v35 }
  0xd6   : > { %v502_v41 = vpop.permute.xlu0 %501  ;;  %673 = vmatprep.subr.mxu0 %v525_v40  ;;  %1003 = vmatprep.subr.mxu1 %v525_v40  ;;  %v506_v42 = vpop.permute.xlu1 %505  ;;  %v389_v40 = vrot.slane %v1582_v16, %v384_v32 }
  0xd7   : > { %v510_v43 = vsel %vm509_vm2, %v502_v41, %v506_v42  ;;  %v512_v44 = vsel %vm509_vm2, %v506_v42, %v502_v41  ;;  %674 = vmatpush1.msra.mxu0 %v524_v39  ;;  %1021 = vmatpush1.msra.mxu1 %v524_v39  ;;  %v385_v39 = vrot.slane %v1580_v15, %v384_v32 }
  0xd8   : > { %v522_v46 = vmul.f32 %v517_v27, %v510_v43  ;;  %v523_v47 = vmul.f32 %v521_v30, %v512_v44 }
  0xda   : > { %v475_v50 = vpop.permute.xlu0 %474  ;;  %675 = vmatprep.subr.mxu0 %v523_v47  ;;  %1004 = vmatprep.subr.mxu1 %v523_v47  ;;  %v479_v51 = vpop.permute.xlu1 %478  ;;  %v355_v47 = vsub.s32 0, %v1575_v12 }
  0xdb   : > { %v482_v52 = vsel %vm480_vm3, %v475_v50, %v479_v51  ;;  %v484_v53 = vsel %vm480_vm3, %v479_v51, %v475_v50  ;;  %676 = vmatpush1.msra.mxu0 %v522_v46  ;;  %1022 = vmatpush1.msra.mxu1 %v522_v46 }
  0xdc   : > { %v495_v54 = vmul.f32 %v488_v45, %v482_v52  ;;  %v496_v55 = vmul.f32 %v492_v48, %v484_v53  ;;  %v360_v12 = vrot.slane %v1582_v16, %v355_v47 }
  0xde   : > { %v473_v58 = vpop.permute.xlu0 %472  ;;  %677 = vmatprep.subr.mxu0 %v496_v55  ;;  %1005 = vmatprep.subr.mxu1 %v496_v55  ;;  %v477_v59 = vpop.permute.xlu1 %476 }
  0xdf   : > { %v481_v61 = vsel %vm480_vm3, %v473_v58, %v477_v59  ;;  %v483_v62 = vsel %vm480_vm3, %v477_v59, %v473_v58  ;;  %678 = vmatpush1.msra.mxu0 %v495_v54  ;;  %1023 = vmatpush1.msra.mxu1 %v495_v54  ;;  %v356_v54 = vrot.slane %v1580_v15, %v355_v47 }
  0xe0   : > { %v493_v63 = vmul.f32 %v488_v45, %v481_v61  ;;  %v494_v4 = vmul.f32 %v492_v48, %v483_v62 }
  0xe2   : > { %v430_v7 = vpop.permute.xlu0 %429  ;;  %679 = vmatprep.subr.mxu0 %v494_v4  ;;  %1006 = vmatprep.subr.mxu1 %v494_v4  ;;  %v434_v9 = vpop.permute.xlu1 %433 }
  0xe3   : > { %v437_v17 = vsel %vm435_vm4, %v430_v7, %v434_v9  ;;  %680 = vmatpush1.msra.mxu0 %v493_v63  ;;  %1024 = vmatpush1.msra.mxu1 %v493_v63  ;;  %v439_v0 = vsel %vm435_vm4, %v434_v9, %v430_v7 }
  0xe4   : > { %681 = vmatprep.subr.mxu0 %v467_v5  ;;  %1007 = vmatprep.subr.mxu1 %v467_v5  ;;  %v451_v18 = vmul.f32 %v447_v8, %v437_v17  ;;  %v450_v21 = vmul.f32 %v443_v14, %v439_v0  ;;  %v983_v5 = vld [vmem:[#allocation8 + $0x10] ss:$0 sm:$0xff] }
  0xe5   : > { %682 = vmatpush1.msra.mxu0 %v466_v6  ;;  %1025 = vmatpush1.msra.mxu1 %v466_v6  ;;  %v984_v6 = vld [vmem:[#allocation8 + $0x18] ss:$0 sm:$0xff] }
  0xe6   : > { %v428_v3 = vpop.permute.xlu0 %427  ;;  %683 = vmatprep.subr.mxu0 %v465_v10  ;;  %1008 = vmatprep.subr.mxu1 %v465_v10  ;;  %v432_v19 = vpop.permute.xlu1 %431 }
  0xe7   : > { %v436_v22 = vsel %vm435_vm4, %v428_v3, %v432_v19  ;;  %v438_v1 = vsel %vm435_vm4, %v432_v19, %v428_v3  ;;  %684 = vmatpush1.msra.mxu0 %v464_v2  ;;  %1026 = vmatpush1.msra.mxu1 %v464_v2 }
  0xe8   : > { %v448_v23 = vmul.f32 %v443_v14, %v438_v1  ;;  %v449_v24 = vmul.f32 %v447_v8, %v436_v22  ;;  %685 = vmatprep.subr.mxu0 %v451_v18  ;;  %1009 = vmatprep.subr.mxu1 %v451_v18  ;;  %v591_v22 = vld [vmem:[#allocation6 + $0x18] sm:$0xff] }
  0xe9   : > { %686 = vmatpush1.msra.mxu0 %v450_v21  ;;  %1027 = vmatpush1.msra.mxu1 %v450_v21  ;;  %v592_v21 = vld [vmem:[#allocation6 + $0x20] sm:$0xff]  ;;  %v595_v1 = vld [vmem:[#allocation6 + $0x38] sm:$0xff] }
  0xea   : > { %v401_v26 = vpop.permute.xlu0 %400  ;;  %v405_v27 = vpop.permute.xlu1 %404  ;;  %687 = vmatprep.subr.mxu0 %v449_v24  ;;  %1010 = vmatprep.subr.mxu1 %v449_v24 }
  0xeb   : > { %v408_v28 = vsel %vm406_vm5, %v401_v26, %v405_v27  ;;  %v410_v29 = vsel %vm406_vm5, %v405_v27, %v401_v26  ;;  %688 = vmatpush1.msra.mxu0 %v448_v23  ;;  %1028 = vmatpush1.msra.mxu1 %v448_v23  ;;  %v594_v23 = vld [vmem:[#allocation6 + $0x30] sm:$0xff] }
  0xec   : > { %v421_v30 = vmul.f32 %v414_v20, %v410_v29  ;;  %v422_v31 = vmul.f32 %v418_v25, %v408_v28 }
  0xee   : > { %v399_v33 = vpop.permute.xlu0 %398  ;;  %v403_v34 = vpop.permute.xlu1 %402  ;;  %689 = vmatprep.subr.mxu0 %v422_v31  ;;  %1011 = vmatprep.subr.mxu1 %v422_v31 }
  0xef   : > { %v407_v35 = vsel %vm406_vm5, %v399_v33, %v403_v34  ;;  %v409_v36 = vsel %vm406_vm5, %v403_v34, %v399_v33  ;;  %690 = vmatpush1.msra.mxu0 %v421_v30  ;;  %1029 = vmatpush1.msra.mxu1 %v421_v30 }
  0xf0   : > { %v419_v37 = vmul.f32 %v414_v20, %v409_v36  ;;  %v420_v38 = vmul.f32 %v418_v25, %v407_v35  ;;  %v588_v20 = vld [vmem:[#allocation6] sm:$0xff] }
  0xf2   : > { %v372_v41 = vpop.permute.xlu0 %371  ;;  %v376_v42 = vpop.permute.xlu1 %375  ;;  %691 = vmatprep.subr.mxu0 %v420_v38  ;;  %1012 = vmatprep.subr.mxu1 %v420_v38 }
  0xf3   : > { %v379_v43 = vsel %vm377_vm6, %v372_v41, %v376_v42  ;;  %v381_v44 = vsel %vm377_vm6, %v376_v42, %v372_v41  ;;  %692 = vmatpush1.msra.mxu0 %v419_v37  ;;  %1030 = vmatpush1.msra.mxu1 %v419_v37 }
  0xf4   : > { %v392_v45 = vmul.f32 %v385_v39, %v381_v44  ;;  %v393_v46 = vmul.f32 %v389_v40, %v379_v43 }
  0xf6   : > { %v370_v48 = vpop.permute.xlu0 %369  ;;  %v374_v49 = vpop.permute.xlu1 %373  ;;  %693 = vmatprep.subr.mxu0 %v393_v46  ;;  %1013 = vmatprep.subr.mxu1 %v393_v46 }
  0xf7   : > { %v378_v50 = vsel %vm377_vm6, %v370_v48, %v374_v49  ;;  %v380_v51 = vsel %vm377_vm6, %v374_v49, %v370_v48  ;;  %694 = vmatpush1.msra.mxu0 %v392_v45  ;;  %1031 = vmatpush1.msra.mxu1 %v392_v45 }
  0xf8   : > { %v390_v52 = vmul.f32 %v385_v39, %v380_v51  ;;  %v391_v53 = vmul.f32 %v389_v40, %v378_v50 }
  0xfa   : > { %v341_v55 = vpop.permute.xlu0 %340  ;;  %v345_v56 = vpop.permute.xlu1 %344  ;;  %695 = vmatprep.subr.mxu0 %v391_v53  ;;  %1014 = vmatprep.subr.mxu1 %v391_v53 }
  0xfb   : > { %v350_v57 = vsel %vm348_vm7, %v341_v55, %v345_v56  ;;  %v352_v58 = vsel %vm348_vm7, %v345_v56, %v341_v55  ;;  %696 = vmatpush1.msra.mxu0 %v390_v52  ;;  %1032 = vmatpush1.msra.mxu1 %v390_v52 }
  0xfc   : > { %v363_v59 = vmul.f32 %v356_v54, %v352_v58  ;;  %v364_v60 = vmul.f32 %v360_v12, %v350_v57  ;;  %v784_v58 = vld [vmem:[%s329_s16] sm:$0xff] }
  0xfe   : > { %v339_v61 = vpop.permute.xlu0 %338  ;;  %v343_v62 = vpop.permute.xlu1 %342  ;;  %697 = vmatprep.subr.mxu0 %v364_v60  ;;  %1015 = vmatprep.subr.mxu1 %v364_v60 }
  0xff   : > { %v349_v15 = vsel %vm348_vm7, %v339_v61, %v343_v62  ;;  %v351_v16 = vsel %vm348_vm7, %v343_v62, %v339_v61  ;;  %698 = vmatpush1.msra.mxu0 %v363_v59  ;;  %1033 = vmatpush1.msra.mxu1 %v363_v59  ;;  %v785_v62 = vld [vmem:[%s329_s16 + $0x8] sm:$0xff] }
 0x100   : > { %v361_v63 = vmul.f32 %v356_v54, %v351_v16  ;;  %v362_v4 = vmul.f32 %v360_v12, %v349_v15 }
 0x102   : > { %v562_v7 = vpop.permute.xlu0 %561  ;;  %v566_v8 = vpop.permute.xlu1 %565  ;;  %699 = vmatprep.subr.mxu0 %v362_v4  ;;  %1016 = vmatprep.subr.mxu1 %v362_v4 }
 0x103   : > { %v569_v9 = vsel %vm567_vm8, %v562_v7, %v566_v8  ;;  %v571_v10 = vsel %vm567_vm8, %v566_v8, %v562_v7  ;;  %700 = vmatpush1.msra.mxu0 %v361_v63  ;;  %1034 = vmatpush1.msra.mxu1 %v361_v63 }
 0x104   : > { %v582_v11 = vmul.f32 %v983_v5, %v569_v9  ;;  %v583_v14 = vmul.f32 %v984_v6, %v571_v10 }
 0x106   : > { %v560_v17 = vpop.permute.xlu0 %559  ;;  %v564_v2 = vpop.permute.xlu1 %563  ;;  %729 = vmatprep.subr.mxu0 %v583_v14  ;;  %1017 = vmatprep.subr.mxu1 %v583_v14 }
 0x107   : > { %v568_v0 = vsel %vm567_vm8, %v560_v17, %v564_v2  ;;  %v570_v18 = vsel %vm567_vm8, %v564_v2, %v560_v17  ;;  %730 = vmatpush2.msra.mxu0 %v582_v11  ;;  %1035 = vmatpush2.msra.mxu1 %v582_v11 }
 0x108   : > { %v580_v3 = vmul.f32 %v983_v5, %v568_v0  ;;  %v581_v19 = vmul.f32 %v984_v6, %v570_v18 }
 0x10a   : > { %731 = vmatprep.subr.mxu0 %v581_v19  ;;  %1018 = vmatprep.subr.mxu1 %v581_v19 }
 0x10b   : > { %732 = vmatpush2.msra.mxu0 %v580_v3  ;;  %1036 = vmatpush2.msra.mxu1 %v580_v3 }
 0x10c   : > { %734 = vmatmul.mubr.f32.vlgmr.msra.gmra.mxu0 %v588_v20  ;;  %746 = vmatmul.mubr.f32.vlgmr.msra.gmra.mxu1 %v592_v21 }
 0x10d   : > { %986 = vmatprep.mubr.msk.f32.mxu0 %vm656_vm0, %v591_v22  ;;  %988 = vmatprep.mubr.msk.f32.mxu1 %vm656_vm0, %v595_v1 }
 0x110   : > { %740 = vmatmul.mubr.f32.gmra.mxu0 %v590_v13  ;;  %752 = vmatmul.mubr.f32.gmra.mxu1 %v594_v23 }
 0x113   : > { %v644_v24 = vpop.permute.xlu1 %643  ;;  %v639_v25 = vpop.permute.xlu0 %638 }
 0x117   : > { %v649_v32 = vpop.permute.xlu1 %648  ;;  %v654_v44 = vpop.permute.xlu0 %653 }
 0x1cc   : > { %v735_v26 = vpop.f32.mrf.mxu0  ;;  %v747_v28 = vpop.f32.mrf.mxu1 }
 0x1cd   : > { %v736_v27 = vadd.f32 %v735_v26, %v639_v25  ;;  %v748_v37 = vadd.f32 %v747_v28, %v649_v32 }
 0x1ce   : > { %v737_v29 = vpop.f32.mrf.mxu0  ;;  %v749_v36 = vpop.f32.mrf.mxu1 }
 0x1cf   : > { %v758_v30 = vmul.f32 0.5, %v736_v27  ;;  %v738_v31 = vadd.f32 %v737_v29, %v639_v25  ;;  %v750_v43 = vadd.f32 %v749_v36, %v649_v32 }
 0x1d0   : > { %v741_v33 = vpop.f32.mrf.mxu0  ;;  %v753_v42 = vpop.f32.mrf.mxu1 }
 0x1d1   : > { %1122 = vtanh.f32 %v758_v30  ;;  %v759_v34 = vmul.f32 0.5, %v738_v31  ;;  %v742_v35 = vadd.f32 %v741_v33, %v644_v24  ;;  %v754_v46 = vadd.f32 %v753_v42, %v654_v44 }
 0x1d2   : > { %v743_v38 = vpop.f32.mrf.mxu0  ;;  %v755_v45 = vpop.f32.mrf.mxu1 }
 0x1d3   : > { %1124 = vtanh.f32 %v759_v34  ;;  %v766_v39 = vmul.f32 0.5, %v742_v35  ;;  %v744_v40 = vadd.f32 %v743_v38, %v644_v24  ;;  %v756_v47 = vadd.f32 %v755_v45, %v654_v44 }
 0x1d4   : > { %v776_v50 = vmul.f32 0.5, %v754_v46 }
 0x1d5   : > { %1126 = vtanh.f32 %v766_v39  ;;  %v767_v41 = vmul.f32 0.5, %v744_v40  ;;  %v777_v53 = vmul.f32 0.5, %v756_v47 }
 0x1d6   : > { %1128 = vtanh.f32 %v748_v37 }
 0x1d7   : > { %1130 = vtanh.f32 %v767_v41 }
 0x1d8   : > { %1132 = vtanh.f32 %v750_v43 }
 0x1d9   : > { %1134 = vtanh.f32 %v776_v50 }
 0x1da   : > { %1136 = vtanh.f32 %v777_v53 }
 0x1de   : > { %v1123_v48 = vpop.eup %1122 }
 0x1df   : > { %v762_v49 = vmul.f32 0.5, %v1123_v48 }
 0x1e0   : > { %v1125_v51 = vpop.eup %1124 }
 0x1e1   : > { %v763_v52 = vmul.f32 0.5, %v1125_v51  ;;  %v764_v55 = vadd.f32 0.5, %v762_v49 }
 0x1e2   : > { %v1127_v54 = vpop.eup %1126 }
 0x1e3   : > { %v1129_v12 = vpop.eup %1128  ;;  %v770_v56 = vmul.f32 0.5, %v1127_v54  ;;  %v765_v59 = vadd.f32 0.5, %v763_v52 }
 0x1e4   : > { %v1131_v57 = vpop.eup %1130  ;;  %v788_v16 = vmul.f32 %v1129_v12, %v764_v55 }
 0x1e5   : > { %v772_v60 = vadd.f32 0.5, %v770_v56  ;;  %v771_v61 = vmul.f32 0.5, %v1131_v57  ;;  %v1133_v4 = vpop.eup %1132 }
 0x1e6   : > { %v789_v7 = vmul.f32 %v1133_v4, %v765_v59 }
 0x1e7   : > { %v786_v15 = vmul.f32 %v784_v58, %v772_v60  ;;  %v773_v63 = vadd.f32 0.5, %v771_v61 }
 0x1e9   : > { %v790_v5 = vadd.f32 %v788_v16, %v786_v15  ;;  %v787_v6 = vmul.f32 %v785_v62, %v773_v63 }
 0x1eb   : > { %1138 = vtanh.f32 %v790_v5  ;;  %v791_v8 = vadd.f32 %v789_v7, %v787_v6  ;;  %798 = vst [vmem:[%s324_s26] sm:$0xff] %v790_v5 }
 0x1ed   : > { %1140 = vtanh.f32 %v791_v8  ;;  %799 = vst [vmem:[%s324_s26 + $0x8] sm:$0xff] %v791_v8 }
 0x1ee   : > { %1235 = shalt.err (!%p1232_p11)
}
 0x1ef   : > { %s1236_s20 = scalar_lea.hbm %s1691_s14, 256  ;;  %s1240_s13 = scalar_lea.hbm %s1754_s6, 512 }
 0x1f0   : > { %p1237_p9 = scmp.ne.s32.totalorder %s1691_s14, %s1236_s20  ;;  %p1241_p6 = scmp.lt.s32.totalorder %s1691_s14, %s1754_s6 }
 0x1f1   : > { %p1242_p8 = scmp.lt.s32.totalorder %s1240_s13, %s1236_s20 }
 0x1f2   : > { %p1238_p1 = pnand %p1237_p9, %p1773_p7 }
 0x1f3   : > { %p1243_p5 = por %p1242_p8, %p1241_p6 }
 0x1f4   : > { %p1239_p4 = pneg %p1238_p1 }
 0x1f6   : > { %p1244_p2 = pnand %p1243_p5, %p1239_p4 }
 0x1f8   : > { %1247 = shalt.err (!%p1244_p2)
}
 0x1f9   : > { %1048 = dma.vmem_to_hbm [thread:$0]  (%p1773_p7), %s835_s11, 256, %s1691_s14, %s806_s29   ;;  %v1135_v9 = vpop.eup %1134 }
 0x1fa   : > { %v1137_v10 = vpop.eup %1136  ;;  %v780_v11 = vmul.f32 0.5, %v1135_v9  ;;  %s317_s27 = scalar_lea.vmem [#allocation9], %s979_s8  ;;  %s818_s11 = scalar_lea.hbm %s1753_s5, %s999_s10 }
 0x1fb   : > { %v781_v14 = vmul.f32 0.5, %v1137_v10  ;;  %v1139_v2 = vpop.eup %1138  ;;  %s820_s17 = sshll.u32 %s317_s27, 4  ;;  %s801_s14 = scalar_lea.sflag [#allocation5], %s1509_s12  ;;  %s821_s17 = int_to_ptr.vmem [resolvable:$true] %s820_s17 }
 0x1fc   : > { %v782_v17 = vadd.f32 0.5, %v780_v11  ;;  %v1141_v3 = vpop.eup %1140  ;;  %s1248_s29 = scalar_lea.vmem %s821_s17, 256  ;;  %s1337_s8 = smov [#allocation9]  }
 0x1fd   : > { %v783_v0 = vadd.f32 0.5, %v781_v14  ;;  %p1249_p12 = scmp.ne.s32.totalorder %s821_s17, %s1248_s29  ;;  %s1252_s16 = sshll.u32 %s1337_s8, 4  ;;  %s1253_s16 = int_to_ptr.vmem [resolvable:$false] %s1252_s16 }
 0x1fe   : > { %v794_v18 = vmul.f32 %v1139_v2, %v782_v17  ;;  %s1254_s26 = scalar_lea.vmem %s1253_s16, 512  ;;  %p1255_p10 = scmp.lt.s32.totalorder %s821_s17, %s1253_s16 }
 0x1ff   : > { %v795_v19 = vmul.f32 %v1141_v3, %v783_v0  ;;  %p1250_p13 = pnand %p1249_p12, %p1773_p7  ;;  %p1256_p3 = scmp.lt.s32.totalorder %s1254_s26, %s1248_s29 }
 0x200   : > { %796 = vst [vmem:[%s317_s27] sm:$0xff] %v794_v18 }
 0x201   : > { %797 = vst [vmem:[%s317_s27 + $0x8] sm:$0xff] %v795_v19  ;;  %p1251_p0 = pneg %p1250_p13  ;;  %p1257_p11 = por %p1256_p3, %p1255_p10 }
 0x203   : > { %p1258_p9 = pnand %p1257_p11, %p1251_p0 }
 0x205   : > { %1261 = shalt.err (!%p1258_p9)
}
 0x206   : > { %s1262_s25 = scalar_lea.hbm %s818_s11, 256  ;;  %s1266_s13 = scalar_lea.hbm %s1753_s5, 512 }
 0x207   : > { %p1263_p1 = scmp.ne.s32.totalorder %s818_s11, %s1262_s25  ;;  %p1267_p8 = scmp.lt.s32.totalorder %s818_s11, %s1753_s5 }
 0x208   : > { %p1268_p5 = scmp.lt.s32.totalorder %s1266_s13, %s1262_s25 }
 0x209   : > { %p1264_p4 = pnand %p1263_p1, %p1773_p7 }
 0x20a   : > { %p1269_p2 = por %p1268_p5, %p1267_p8 }
 0x20b   : > { %p1265_p6 = pneg %p1264_p4 }
 0x20d   : > { %p1270_p12 = pnand %p1269_p2, %p1265_p6 }
 0x20f   : > { %1273 = shalt.err (!%p1270_p12)
}
 0x210   : > { %1047 = dma.vmem_to_hbm [thread:$0]  (%p1773_p7), %s821_s17, 256, %s818_s11, %s801_s14  }
 0x211 PF: > { %s846_s27 = sand.u32 1, %s1308_s21   ;;  %p1774_p13 = scmp.ne.s32.totalorder %s1762_s28, 0 }
 0x212   : > { %p1775_p0 = scmp.ge.s32.totalorder %s1320_s24, 2  ;;  %s847_s18 = scalar_lea.sflag [#allocation5], %s846_s27 }
 0x214   : > { %p1063_p10 = pnand %p1775_p0, %p1774_p13 }
 0x216   : > { %p1064_p3 = pneg %p1063_p10 }
 0x218   : > { %1299 = dma.done.wait (%p1064_p3), %s847_s18, 256  }
 0x219   : > { %1301 = vsyncadd (%p1064_p3), %s847_s18, 4294967040  ;;  %s856_s20 = scalar_lea.sflag [#allocation11], %s846_s27 }
 0x21a   : > { %1303 = dma.done.wait (%p1064_p3), %s856_s20, 256  }
 0x21b   : > { %1305 = vsyncadd (%p1064_p3), %s856_s20, 4294967040  ;;  %p24_p7 = scmp.ge.s32.totalorder %s1451_s19, 4   ;;  %s1776_s21 = smov %s1312_s22 }
 0x21c   : > { %s1777_s22 = smov %s1316_s23  ;;  %s1778_s23 = smov %s1467_s7 }
 0x21d   : > { %s1779_s24 = smov %s1451_s19  ;;  %26 = sbr.rel (!%p24_p7) target bundleno = 8 (0x8), region = 113 }
 0x222   :  { %861 = vsyncpa [#allocation4], 1 }
 0x223   :  { %863 = vsyncpa [#allocation4 + $0x1], 1 }
 0x224   :  { %864 = vsyncpa [#allocation7], 1 }
 0x225   :  { %865 = vsyncpa [#allocation5], 1 }
 0x226   :  { %867 = vsyncpa [#allocation5 + $0x1], 1 }
 0x227   :  { %868 = vsyncpa [#allocation11], 1 }
 0x228   :  { %870 = vsyncpa [#allocation11 + $0x1], 1 }

// kernel: tpu_custom_call.1
= control target key start
LH: loop header
LB: loop body
LE: loop exit
PB: predicated region body
PF: predicated region fallthrough
CT: control target
= control target key end

     0   :  { %12 = vsyncpa [#allocation4], 0  ;;  %s1748_s0 = inlined_call_operand.hbm [shape: f32[2,16,256], index: 0, kind: input, shape index: {}]   ;;  %s1749_s1 = inlined_call_operand.vmem [shape: f32[2,8,256], index: 1, kind: input, shape index: {}]   ;;  %s1750_s2 = inlined_call_operand.hbm [shape: f32[32,144], index: 2, kind: input, shape index: {}]   ;;  %s1751_s3 = inlined_call_operand.vmem [shape: f32[32,1], index: 3, kind: input, shape index: {}]   ;;  %s1752_s4 = inlined_call_operand.hbm [shape: f32[9,256], index: 4, kind: input, shape index: {}]   ;;  %s1753_s5 = inlined_call_operand.hbm [shape: f32[2,8,256], index: 5, kind: output, shape index: {0}]   ;;  %s1754_s6 = inlined_call_operand.hbm [shape: f32[2,8,256], index: 6, kind: output, shape index: {1}]  }
   0x1   :  { %14 = vsyncpa [#allocation4 + $0x1], 0 }
   0x2   :  { %15 = vsyncpa [#allocation7], 0 }
   0x3   :  { %16 = vsyncpa [#allocation5], 0 }
   0x4   :  { %18 = vsyncpa [#allocation5 + $0x1], 0 }
   0x5   :  { %19 = vsyncpa [#allocation11], 0 }
   0x6   :  { %21 = vsyncpa [#allocation11 + $0x1], 0  ;;  %s1373_s21 = smov 0   ;;  %s1375_s22 = smov 0  }
   0x7   :  { %s1377_s23 = smov 0   ;;  %s1379_s24 = smov 0  }
   0x8 LB: > { %s1394_s25 = sadd.s32 4294967295, %s1320_s24   ;;  %s967_s26 = sadd.s32 4294967294, %s1320_s24   ;;  %s1320_s24 = sphi %s1379_s24, %s1779_s24   ;;  %s1316_s23 = sphi %s1377_s23, %s1778_s23   ;;  %s1312_s22 = sphi %s1375_s22, %s1777_s22   ;;  %s1308_s21 = sphi %s1373_s21, %s1776_s21  }
   0x9   : > { %p47_p0 = scmp.ne.s32.totalorder %s1312_s22, %s1308_s21  ;;  %p1755_p1 = scmp.eq.s32.totalorder %s1394_s25, 0 }
   0xa   : > { %p160_p2 = scmp.eq.s32.totalorder %s1394_s25, 1  ;;  %p166_p3 = scmp.eq.s32.totalorder %s967_s26, 1 }
   0xb   : > { %p1403_p4 = por %p1755_p1, %p47_p0  ;;  %p968_p5 = scmp.ge.s32.totalorder %s1320_s24, 1 }
   0xc   : > { %p1408_p6 = por %p166_p3, %p47_p0  ;;  %p199_p7 = scmp.lt.s32.totalorder %s1320_s24, 3 }
   0xd   : > { %s1761_s27 = scalar_select %p1403_p4, 1, 0 }
   0xe   : > { %s1762_s28 = scalar_select %p1408_p6, 1, 0 }
   0xf   : > { %p1413_p8 = pnand %p968_p5, %p199_p7  ;;  %s1322_s30 = smov [#allocation6]  }
  0x10   : > { %s211_s7 = sshll.u32 %s1322_s30, 4  ;;  %s1323_s9 = smov [#allocation8]   ;;  %s212_s7 = int_to_ptr.vmem [resolvable:$true] %s211_s7 }
  0x11   : > { %s1763_s29 = scalar_select %p1413_p8, 1, 0 }
  0x12   : > { %p1051_p9 = pneg %p1413_p8  ;;  %s227_s10 = sshll.u32 %s1323_s9, 4  ;;  %s228_s10 = int_to_ptr.vmem [resolvable:$true] %s227_s10 }
  0x13   : > { %s1153_s11 = scalar_lea.vmem %s212_s7, 1024  ;;  %p1161_p5 = scmp.lt.s32.totalorder %s212_s7, %s212_s7 }
  0x14   : > { %p1422_p11 = pnand %p1051_p9, %p1755_p1  ;;  %p1154_p13 = scmp.ne.s32.totalorder %s212_s7, %s1153_s11 }
  0x15   : > { %p1162_p7 = scmp.lt.s32.totalorder %s1153_s11, %s1153_s11 }
  0x16   : > { %p1144_p12 = pneg %p1422_p11 }
  0x17   : > { %p1163_p10 = por %p1162_p7, %p1161_p5 }
  0x18   : > { %p1156_p0 = pnand %p1154_p13, %p1144_p12 }
  0x1a   : > { %p1157_p3 = pneg %p1156_p0 }
  0x1c   : > { %p1164_p9 = pnand %p1163_p10, %p1157_p3 }
  0x1e   : > { %1167 = shalt.err (!%p1164_p9)
}
  0x1f   : > { %s1756_s12 = smov 256   ;;  %s1757_s13 = smov 16  }
  0x20   : > { %1054 = dma.hbm_to_vmem [thread:$0]  (!%p1422_p11), %s1750_s2, 1024, %s212_s7, [#allocation7], %s1756_s12, %s1756_s12, %s1757_s13  }
  0x21   : > { %s1179_s16 = scalar_lea.vmem %s228_s10, 512  ;;  %p1187_p10 = scmp.lt.s32.totalorder %s228_s10, %s228_s10 }
  0x22   : > { %p1180_p13 = scmp.ne.s32.totalorder %s228_s10, %s1179_s16  ;;  %p1188_p3 = scmp.lt.s32.totalorder %s1179_s16, %s1179_s16 }
  0x24   : > { %p1182_p0 = pnand %p1180_p13, %p1144_p12  ;;  %p1189_p7 = por %p1188_p3, %p1187_p10 }
  0x26   : > { %p1183_p5 = pneg %p1182_p0 }
  0x28   : > { %p1190_p9 = pnand %p1189_p7, %p1183_p5 }
  0x2a   : > { %1193 = shalt.err (!%p1190_p9)
}
  0x2b   : > { %1057 = dma.hbm_to_vmem [thread:$0]  (!%p1422_p11), %s1752_s4, 512, %s228_s10, [#allocation7], %s1756_s12, %s1756_s12, %s1757_s13  }
  0x2c   : > { %s1451_s19 = sadd.s32 1, %s1320_s24   ;;  %s34_s20 = sadd.s32 1, %s1316_s23 }
  0x2d   : > { %s31_s26 = ssub.s32 %s1320_s24, %s1451_s19  ;;  %p41_p12 = scmp.ne.s32.totalorder %s1316_s23, %s1312_s22 }
  0x2e   : > { %p32_p13 = scmp.eq.s32.totalorder %s31_s26, 0  ;;  %p42_p0 = scmp.eq.s32.totalorder %s1320_s24, 0 }
  0x2f   : > { %p1461_p5 = por %p160_p2, %p41_p12  ;;  %p1071_p10 = scmp.lt.s32.totalorder %s1320_s24, 2 }
  0x30   : > { %s1467_s7 = scalar_select %p32_p13, %s1316_s23, %s34_s20  }
  0x31   : > { %s1765_s30 = scalar_select %p1461_p5, 1, 0 }
  0x32   : > { %p43_p3 = por %p42_p0, %p41_p12  ;;  %s241_s8 = sand.u32 1, %s1316_s23  }
  0x33   : > { %s972_s9 = sshll.u32 %s241_s8, 5  ;;  %s997_s10 = sshll.u32 %s1320_s24, 9 }
  0x34   : > { %s1474_s15 = scalar_lea.hbm %s1748_s0, %s997_s10  ;;  %s245_s16 = scalar_lea.vmem [#allocation3], %s972_s9 }
  0x35   : > { %s252_s17 = sshll.u32 %s245_s16, 4  ;;  %p1478_p2 = pnand %p1071_p10, %p43_p3  ;;  %s1476_s17 = int_to_ptr.vmem [resolvable:$true] %s252_s17 }
  0x36   : > { %s1482_s20 = scalar_lea.sflag [#allocation4], %s241_s8  ;;  %s1194_s26 = scalar_lea.hbm %s1474_s15, 512 }
  0x37   : > { %p1195_p11 = scmp.ne.s32.totalorder %s1474_s15, %s1194_s26  ;;  %p1196_p7 = pneg %p1478_p2 }
  0x38   : > { %s1199_s9 = scalar_lea.hbm %s1748_s0, 1024  ;;  %p1200_p13 = scmp.lt.s32.totalorder %s1474_s15, %s1748_s0 }
  0x39   : > { %p1197_p9 = pnand %p1196_p7, %p1195_p11  ;;  %p1201_p0 = scmp.lt.s32.totalorder %s1199_s9, %s1194_s26 }
  0x3b   : > { %p1198_p12 = pneg %p1197_p9  ;;  %p1202_p10 = por %p1201_p0, %p1200_p13 }
  0x3d   : > { %p1203_p3 = pnand %p1202_p10, %p1198_p12 }
  0x3f   : > { %1206 = shalt.err (!%p1203_p3)
}
  0x40   : > { %s1207_s8 = scalar_lea.vmem %s1476_s17, 512  ;;  %s1326_s12 = smov [#allocation3]  }
  0x41   : > { %p1208_p1 = scmp.ne.s32.totalorder %s1476_s17, %s1207_s8  ;;  %s1212_s13 = sshll.u32 %s1326_s12, 4  ;;  %s1213_s13 = int_to_ptr.vmem [resolvable:$false] %s1212_s13 }
  0x42   : > { %s1214_s10 = scalar_lea.vmem %s1213_s13, 1024  ;;  %p1215_p9 = scmp.lt.s32.totalorder %s1476_s17, %s1213_s13 }
  0x43   : > { %p1210_p6 = pnand %p1208_p1, %p1196_p7  ;;  %p1216_p5 = scmp.lt.s32.totalorder %s1214_s10, %s1207_s8 }
  0x45   : > { %p1211_p11 = pneg %p1210_p6  ;;  %p1217_p4 = por %p1216_p5, %p1215_p9 }
  0x47   : > { %p1218_p8 = pnand %p1217_p4, %p1211_p11 }
  0x49   : > { %1221 = shalt.err (!%p1218_p8)
}
  0x4a   : > { %s1767_s26 = smov 16   ;;  %s1768_s11 = smov 256  }
  0x4b   : > { %1061 = dma.hbm_to_vmem [thread:$0]  (!%p1478_p2), %s1474_s15, 512, %s1476_s17, %s1482_s20, %s1768_s11, %s1768_s11, %s1767_s26  }
  0x4c   : > { %p1769_p1 = scmp.ne.s32.totalorder %s1763_s29, 0 }
  0x4d   : > { %s1509_s12 = sand.u32 (!%p1769_p1), 1, %s1312_s22   ;;  %p1770_p4 = scmp.ne.s32.totalorder (!%p1769_p1), %s1761_s27, 0 }
  0x4e   : > { %272 = sbr.rel (%p1769_p1) target bundleno = 529 (0x211), region = 40  ;;  %s976_s13 = sshll.u32 (!%p1769_p1), %s1509_s12, 5 }
  0x4f   : > { %s275_s9 = scalar_lea.sflag (!%p1769_p1), [#allocation4], %s1509_s12  ;;  %s278_s14 = scalar_lea.vmem (!%p1769_p1), [#allocation3], %s976_s13 }
  0x53   : > { %1291 = dma.done.wait (%p1770_p4), %s275_s9, 512  }
  0x54   : > { %1293 = vsyncadd (%p1770_p4), %s275_s9, 4294966784  ;;  %p1771_p6 = scmp.eq.s32.totalorder %s1394_s25, 0 }
  0x56   : > { %1295 = dma.done.wait (%p1771_p6), [#allocation7], 1536   ;;  %p1772_p8 = pmov %p1771_p6 }
  0x57   : > { %v1521_v0 = vld [vmem:[%s278_s14 + $0x10] sm:$0xff]  ;;  %v1523_v1 = vld [vmem:[%s278_s14] sm:$0xff]  ;;  %s1327_s29 = smov 112   ;;  %v1527_v2 = vld [vmem:[%s278_s14 + $0x18] sm:$0xff]  ;;  %s1328_s27 = smov 113   ;;  %vm656_vm0 = vcmask 130048   ;;  %v346_v11 = vlaneseq }
  0x58   : > { %1297 = vsyncadd (%p1772_p8), [#allocation7], 4294965760  ;;  %532 = vrot.lane.b32.xlu0 %v1521_v0, %s1327_s29  ;;  %530 = vrot.lane.b32.xlu1 %v1523_v1, %s1327_s29  ;;  %v1529_v3 = vld [vmem:[%s278_s14 + $0x8] sm:$0xff]  ;;  %s1329_s15 = smov 127   ;;  %s1330_s17 = smov 1   ;;  %v1335_v6 = vmov 0  }
  0x59   : > { %s1331_s18 = smov 15   ;;  %s1332_s20 = smov 16   ;;  %v589_v4 = vld [vmem:[#allocation6 + $0x8] sm:$0xff]  ;;  %1120 = vset.pattern.permute.xlu0 %v1335_v6  ;;  %1121 = vset.pattern.permute.xlu1 %v1335_v6  ;;  %v632_v7 = vld [vmem:[%s1751_s3] sm:$0xff]  ;;  %v635_v9 = vld [vmem:[%s1751_s3 + $0x18] sm:$0xff]  ;;  %v1575_v12 = vshrl.u32 %v346_v11, 7 }
  0x5a   : > { %s1333_s16 = smov 17   ;;  %v593_v5 = vld [vmem:[#allocation6 + $0x28] sm:$0xff]  ;;  %985 = vmatprep.mubr.msk.f32.mxu0 %vm656_vm0, %v589_v4  ;;  %s1334_s8 = smov 111   ;;  %v634_v10 = vld [vmem:[%s1751_s3 + $0x10] sm:$0xff]  ;;  %v1577_v13 = vand.u32 127, %v346_v11  ;;  %v1580_v15 = vld [vmem:[#allocation8] sm:$0xff] }
  0x5b   : > { %987 = vmatprep.mubr.msk.f32.mxu1 %vm656_vm0, %v593_v5  ;;  %v633_v8 = vld [vmem:[%s1751_s3 + $0x8] sm:$0xff]  ;;  %v545_v14 = vsub.s32 7, %v1575_v12  ;;  %v516_v19 = vsub.s32 6, %v1575_v12  ;;  %v487_v38 = vsub.s32 5, %v1575_v12  ;;  %v458_v49 = vsub.s32 4, %v1575_v12  ;;  %p325_p5 = scmp.lt.s32.totalorder %s1394_s25, 1 }
  0x5c   : > { %536 = vrot.lane.b32.xlu0 %v1527_v2, %s1327_s29  ;;  %534 = vrot.lane.b32.xlu1 %v1529_v3, %s1327_s29  ;;  %v1582_v16 = vld [vmem:[#allocation8 + $0x8] sm:$0xff]  ;;  %vm538_vm1 = vcmp.lt.s32.totalorder %v1577_v13, 112  ;;  %vm509_vm2 = vcmp.lt.s32.totalorder %v1577_v13, 113  ;;  %vm480_vm3 = vcmp.lt.s32.totalorder %v1577_v13, 127  ;;  %v442_v60 = vsub.s32 3, %v1575_v12  ;;  %s999_s10 = sshll.u32 %s1394_s25, 8 }
  0x5d   : > { %v546_v20 = vrot.slane %v1580_v15, %v545_v14  ;;  %v550_v21 = vrot.slane %v1582_v16, %v545_v14  ;;  %v517_v27 = vrot.slane %v1580_v15, %v516_v19  ;;  %v521_v30 = vrot.slane %v1582_v16, %v516_v19  ;;  %s1691_s14 = scalar_lea.hbm %s1754_s6, %s999_s10  ;;  %s806_s29 = scalar_lea.sflag [#allocation11], %s1509_s12 }
  0x5e   : > { %v488_v45 = vrot.slane %v1580_v15, %v487_v38  ;;  %v492_v48 = vrot.slane %v1582_v16, %v487_v38  ;;  %v463_v56 = vrot.slane %v1582_v16, %v458_v49  ;;  %v459_v57 = vrot.slane %v1580_v15, %v458_v49  ;;  %p1773_p7 = scmp.ne.s32.totalorder %s1765_s30, 0 }
  0x5f   : > { %vm435_vm4 = vcmp.lt.s32.totalorder %v1577_v13, 1  ;;  %v413_v11 = vsub.s32 2, %v1575_v12  ;;  %v443_v14 = vrot.slane %v1580_v15, %v442_v60  ;;  %vm406_vm5 = vcmp.lt.s32.totalorder %v1577_v13, 15 }
  0x60   : > { %503 = vrot.lane.b32.xlu0 %v1521_v0, %s1328_s27  ;;  %507 = vrot.lane.b32.xlu1 %v1527_v2, %s1328_s27  ;;  %v467_v5 = vmul.f32 %v463_v56, %v1527_v2  ;;  %v466_v6 = vmul.f32 %v459_v57, %v1521_v0  ;;  %vm377_vm6 = vcmp.lt.s32.totalorder %v1577_v13, 16  ;;  %vm348_vm7 = vcmp.lt.s32.totalorder %v1577_v13, 17 }
  0x61   : > { %vm567_vm8 = vcmp.lt.s32.totalorder %v1577_v13, 111  ;;  %v590_v13 = vld [vmem:[#allocation6 + $0x10] sm:$0xff] }
  0x64   : > { %501 = vrot.lane.b32.xlu0 %v1523_v1, %s1328_s27  ;;  %505 = vrot.lane.b32.xlu1 %v1529_v3, %s1328_s27 }
  0x68   : > { %474 = vrot.lane.b32.xlu0 %v1521_v0, %s1329_s15  ;;  %478 = vrot.lane.b32.xlu1 %v1527_v2, %s1329_s15 }
  0x6c   : > { %472 = vrot.lane.b32.xlu0 %v1523_v1, %s1329_s15  ;;  %476 = vrot.lane.b32.xlu1 %v1529_v3, %s1329_s15  ;;  %s326_s15 = scalar_select %p325_p5, %s1394_s25, 1 }
  0x70   : > { %429 = vrot.lane.b32.xlu0 %v1521_v0, %s1330_s17  ;;  %433 = vrot.lane.b32.xlu1 %v1527_v2, %s1330_s17 }
  0x74   : > { %427 = vrot.lane.b32.xlu0 %v1523_v1, %s1330_s17  ;;  %431 = vrot.lane.b32.xlu1 %v1529_v3, %s1330_s17  ;;  %s998_s17 = sshll.u32 %s326_s15, 4  ;;  %s1336_s15 = smov [#allocation10]  }
  0x78   : > { %400 = vrot.lane.b32.xlu0 %v1521_v0, %s1331_s18  ;;  %404 = vrot.lane.b32.xlu1 %v1527_v2, %s1331_s18 }
  0x7c   : > { %398 = vrot.lane.b32.xlu0 %v1523_v1, %s1331_s18  ;;  %402 = vrot.lane.b32.xlu1 %v1529_v3, %s1331_s18 }
  0x80   : > { %371 = vrot.lane.b32.xlu0 %v1521_v0, %s1332_s20  ;;  %375 = vrot.lane.b32.xlu1 %v1527_v2, %s1332_s20 }
  0x84   : > { %369 = vrot.lane.b32.xlu0 %v1523_v1, %s1332_s20  ;;  %373 = vrot.lane.b32.xlu1 %v1529_v3, %s1332_s20 }
  0x88   : > { %340 = vrot.lane.b32.xlu0 %v1521_v0, %s1333_s16  ;;  %344 = vrot.lane.b32.xlu1 %v1527_v2, %s1333_s16 }
  0x8c   : > { %338 = vrot.lane.b32.xlu0 %v1523_v1, %s1333_s16  ;;  %342 = vrot.lane.b32.xlu1 %v1529_v3, %s1333_s16  ;;  %s329_s16 = scalar_lea.vmem %s1749_s1, %s998_s17  ;;  %s1226_s17 = sshll.u32 %s1336_s15, 4  ;;  %s1227_s17 = int_to_ptr.vmem [resolvable:$false] %s1226_s17 }
  0x8d   : > { %s1228_s18 = scalar_lea.vmem %s1227_s17, 512 }
  0x90   : > { %561 = vrot.lane.b32.xlu0 %v1521_v0, %s1334_s8  ;;  %565 = vrot.lane.b32.xlu1 %v1527_v2, %s1334_s8  ;;  %v464_v2 = vmul.f32 %v459_v57, %v1523_v1 }
  0x94   : > { %559 = vrot.lane.b32.xlu0 %v1523_v1, %s1334_s8  ;;  %563 = vrot.lane.b32.xlu1 %v1529_v3, %s1334_s8  ;;  %s979_s8 = sshll.u32 %s1509_s12, 4 }
  0x95   : > { %s324_s26 = scalar_lea.vmem [#allocation10], %s979_s8 }
  0x96   : > { %s834_s11 = sshll.u32 %s324_s26, 4  ;;  %s835_s11 = int_to_ptr.vmem [resolvable:$true] %s834_s11 }
  0x97   : > { %s1222_s27 = scalar_lea.vmem %s835_s11, 256  ;;  %p1229_p0 = scmp.lt.s32.totalorder %s835_s11, %s1227_s17 }
  0x98   : > { %638 = vperm.xlu0 %1120, %v632_v7   ;;  %643 = vperm.xlu1 %1121, %v633_v8   ;;  %v447_v8 = vrot.slane %v1582_v16, %v442_v60  ;;  %p1223_p2 = scmp.ne.s32.totalorder %s835_s11, %s1222_s27  ;;  %p1230_p10 = scmp.lt.s32.totalorder %s1228_s18, %s1222_s27 }
  0x9a   : > { %p1224_p12 = pnand %p1223_p2, %p1773_p7  ;;  %p1231_p3 = por %p1230_p10, %p1229_p0 }
  0x9c   : > { %653 = vperm.xlu0 %1120, %v635_v9   ;;  %648 = vperm.xlu1 %1121, %v634_v10   ;;  %v465_v10 = vmul.f32 %v463_v56, %v1529_v3  ;;  %p1225_p13 = pneg %p1224_p12 }
  0x9e   : > { %p1232_p11 = pnand %p1231_p3, %p1225_p13 }
  0xca   : > { %v533_v17 = vpop.permute.xlu0 %532  ;;  %v531_v18 = vpop.permute.xlu1 %530 }
  0xce   : > { %v537_v22 = vpop.permute.xlu0 %536  ;;  %v535_v23 = vpop.permute.xlu1 %534 }
  0xcf   : > { %v540_v24 = vsel %vm538_vm1, %v533_v17, %v537_v22  ;;  %v542_v25 = vsel %vm538_vm1, %v537_v22, %v533_v17  ;;  %v541_v26 = vsel %vm538_vm1, %v535_v23, %v531_v18  ;;  %v539_v28 = vsel %vm538_vm1, %v531_v18, %v535_v23 }
  0xd0   : > { %v554_v29 = vmul.f32 %v550_v21, %v542_v25  ;;  %v553_v31 = vmul.f32 %v546_v20, %v540_v24  ;;  %v552_v32 = vmul.f32 %v550_v21, %v541_v26  ;;  %v551_v35 = vmul.f32 %v546_v20, %v539_v28 }
  0xd1   : > { %v414_v20 = vrot.slane %v1580_v15, %v413_v11  ;;  %v418_v25 = vrot.slane %v1582_v16, %v413_v11 }
  0xd2   : > { %669 = vmatprep.subr.mxu0 %v554_v29  ;;  %1001 = vmatprep.subr.mxu1 %v554_v29  ;;  %v504_v33 = vpop.permute.xlu0 %503  ;;  %v508_v34 = vpop.permute.xlu1 %507 }
  0xd3   : > { %v511_v36 = vsel %vm509_vm2, %v504_v33, %v508_v34  ;;  %v513_v37 = vsel %vm509_vm2, %v508_v34, %v504_v33  ;;  %670 = vmatpush1.msra.mxu0 %v553_v31  ;;  %1019 = vmatpush1.msra.mxu1 %v553_v31 }
  0xd4   : > { %v524_v39 = vmul.f32 %v517_v27, %v511_v36  ;;  %v525_v40 = vmul.f32 %v521_v30, %v513_v37  ;;  %671 = vmatprep.subr.mxu0 %v552_v32  ;;  %1002 = vmatprep.subr.mxu1 %v552_v32  ;;  %v384_v32 = vsub.s32 1, %v1575_v12 }
  0xd5   : > { %672 = vmatpush1.msra.mxu0 %v551_v35  ;;  %1020 = vmatpush1.msra.mxu1 %v551_v35 }
  0xd6   : > { %v502_v41 = vpop.permute.xlu0 %501  ;;  %673 = vmatprep.subr.mxu0 %v525_v40  ;;  %1003 = vmatprep.subr.mxu1 %v525_v40  ;;  %v506_v42 = vpop.permute.xlu1 %505  ;;  %v389_v40 = vrot.slane %v1582_v16, %v384_v32 }
  0xd7   : > { %v510_v43 = vsel %vm509_vm2, %v502_v41, %v506_v42  ;;  %v512_v44 = vsel %vm509_vm2, %v506_v42, %v502_v41  ;;  %674 = vmatpush1.msra.mxu0 %v524_v39  ;;  %1021 = vmatpush1.msra.mxu1 %v524_v39  ;;  %v385_v39 = vrot.slane %v1580_v15, %v384_v32 }
  0xd8   : > { %v522_v46 = vmul.f32 %v517_v27, %v510_v43  ;;  %v523_v47 = vmul.f32 %v521_v30, %v512_v44 }
  0xda   : > { %v475_v50 = vpop.permute.xlu0 %474  ;;  %675 = vmatprep.subr.mxu0 %v523_v47  ;;  %1004 = vmatprep.subr.mxu1 %v523_v47  ;;  %v479_v51 = vpop.permute.xlu1 %478  ;;  %v355_v47 = vsub.s32 0, %v1575_v12 }
  0xdb   : > { %v482_v52 = vsel %vm480_vm3, %v475_v50, %v479_v51  ;;  %v484_v53 = vsel %vm480_vm3, %v479_v51, %v475_v50  ;;  %676 = vmatpush1.msra.mxu0 %v522_v46  ;;  %1022 = vmatpush1.msra.mxu1 %v522_v46 }
  0xdc   : > { %v495_v54 = vmul.f32 %v488_v45, %v482_v52  ;;  %v496_v55 = vmul.f32 %v492_v48, %v484_v53  ;;  %v360_v12 = vrot.slane %v1582_v16, %v355_v47 }
  0xde   : > { %v473_v58 = vpop.permute.xlu0 %472  ;;  %677 = vmatprep.subr.mxu0 %v496_v55  ;;  %1005 = vmatprep.subr.mxu1 %v496_v55  ;;  %v477_v59 = vpop.permute.xlu1 %476 }
  0xdf   : > { %v481_v61 = vsel %vm480_vm3, %v473_v58, %v477_v59  ;;  %v483_v62 = vsel %vm480_vm3, %v477_v59, %v473_v58  ;;  %678 = vmatpush1.msra.mxu0 %v495_v54  ;;  %1023 = vmatpush1.msra.mxu1 %v495_v54  ;;  %v356_v54 = vrot.slane %v1580_v15, %v355_v47 }
  0xe0   : > { %v493_v63 = vmul.f32 %v488_v45, %v481_v61  ;;  %v494_v4 = vmul.f32 %v492_v48, %v483_v62 }
  0xe2   : > { %v430_v7 = vpop.permute.xlu0 %429  ;;  %679 = vmatprep.subr.mxu0 %v494_v4  ;;  %1006 = vmatprep.subr.mxu1 %v494_v4  ;;  %v434_v9 = vpop.permute.xlu1 %433 }
  0xe3   : > { %v437_v17 = vsel %vm435_vm4, %v430_v7, %v434_v9  ;;  %680 = vmatpush1.msra.mxu0 %v493_v63  ;;  %1024 = vmatpush1.msra.mxu1 %v493_v63  ;;  %v439_v0 = vsel %vm435_vm4, %v434_v9, %v430_v7 }
  0xe4   : > { %681 = vmatprep.subr.mxu0 %v467_v5  ;;  %1007 = vmatprep.subr.mxu1 %v467_v5  ;;  %v451_v18 = vmul.f32 %v447_v8, %v437_v17  ;;  %v450_v21 = vmul.f32 %v443_v14, %v439_v0  ;;  %v983_v5 = vld [vmem:[#allocation8 + $0x10] ss:$0 sm:$0xff] }
  0xe5   : > { %682 = vmatpush1.msra.mxu0 %v466_v6  ;;  %1025 = vmatpush1.msra.mxu1 %v466_v6  ;;  %v984_v6 = vld [vmem:[#allocation8 + $0x18] ss:$0 sm:$0xff] }
  0xe6   : > { %v428_v3 = vpop.permute.xlu0 %427  ;;  %683 = vmatprep.subr.mxu0 %v465_v10  ;;  %1008 = vmatprep.subr.mxu1 %v465_v10  ;;  %v432_v19 = vpop.permute.xlu1 %431 }
  0xe7   : > { %v436_v22 = vsel %vm435_vm4, %v428_v3, %v432_v19  ;;  %v438_v1 = vsel %vm435_vm4, %v432_v19, %v428_v3  ;;  %684 = vmatpush1.msra.mxu0 %v464_v2  ;;  %1026 = vmatpush1.msra.mxu1 %v464_v2 }
  0xe8   : > { %v448_v23 = vmul.f32 %v443_v14, %v438_v1  ;;  %v449_v24 = vmul.f32 %v447_v8, %v436_v22  ;;  %685 = vmatprep.subr.mxu0 %v451_v18  ;;  %1009 = vmatprep.subr.mxu1 %v451_v18  ;;  %v591_v22 = vld [vmem:[#allocation6 + $0x18] sm:$0xff] }
  0xe9   : > { %686 = vmatpush1.msra.mxu0 %v450_v21  ;;  %1027 = vmatpush1.msra.mxu1 %v450_v21  ;;  %v592_v21 = vld [vmem:[#allocation6 + $0x20] sm:$0xff]  ;;  %v595_v1 = vld [vmem:[#allocation6 + $0x38] sm:$0xff] }
  0xea   : > { %v401_v26 = vpop.permute.xlu0 %400  ;;  %v405_v27 = vpop.permute.xlu1 %404  ;;  %687 = vmatprep.subr.mxu0 %v449_v24  ;;  %1010 = vmatprep.subr.mxu1 %v449_v24 }
  0xeb   : > { %v408_v28 = vsel %vm406_vm5, %v401_v26, %v405_v27  ;;  %v410_v29 = vsel %vm406_vm5, %v405_v27, %v401_v26  ;;  %688 = vmatpush1.msra.mxu0 %v448_v23  ;;  %1028 = vmatpush1.msra.mxu1 %v448_v23  ;;  %v594_v23 = vld [vmem:[#allocation6 + $0x30] sm:$0xff] }
  0xec   : > { %v421_v30 = vmul.f32 %v414_v20, %v410_v29  ;;  %v422_v31 = vmul.f32 %v418_v25, %v408_v28 }
  0xee   : > { %v399_v33 = vpop.permute.xlu0 %398  ;;  %v403_v34 = vpop.permute.xlu1 %402  ;;  %689 = vmatprep.subr.mxu0 %v422_v31  ;;  %1011 = vmatprep.subr.mxu1 %v422_v31 }
  0xef   : > { %v407_v35 = vsel %vm406_vm5, %v399_v33, %v403_v34  ;;  %v409_v36 = vsel %vm406_vm5, %v403_v34, %v399_v33  ;;  %690 = vmatpush1.msra.mxu0 %v421_v30  ;;  %1029 = vmatpush1.msra.mxu1 %v421_v30 }
  0xf0   : > { %v419_v37 = vmul.f32 %v414_v20, %v409_v36  ;;  %v420_v38 = vmul.f32 %v418_v25, %v407_v35  ;;  %v588_v20 = vld [vmem:[#allocation6] sm:$0xff] }
  0xf2   : > { %v372_v41 = vpop.permute.xlu0 %371  ;;  %v376_v42 = vpop.permute.xlu1 %375  ;;  %691 = vmatprep.subr.mxu0 %v420_v38  ;;  %1012 = vmatprep.subr.mxu1 %v420_v38 }
  0xf3   : > { %v379_v43 = vsel %vm377_vm6, %v372_v41, %v376_v42  ;;  %v381_v44 = vsel %vm377_vm6, %v376_v42, %v372_v41  ;;  %692 = vmatpush1.msra.mxu0 %v419_v37  ;;  %1030 = vmatpush1.msra.mxu1 %v419_v37 }
  0xf4   : > { %v392_v45 = vmul.f32 %v385_v39, %v381_v44  ;;  %v393_v46 = vmul.f32 %v389_v40, %v379_v43 }
  0xf6   : > { %v370_v48 = vpop.permute.xlu0 %369  ;;  %v374_v49 = vpop.permute.xlu1 %373  ;;  %693 = vmatprep.subr.mxu0 %v393_v46  ;;  %1013 = vmatprep.subr.mxu1 %v393_v46 }
  0xf7   : > { %v378_v50 = vsel %vm377_vm6, %v370_v48, %v374_v49  ;;  %v380_v51 = vsel %vm377_vm6, %v374_v49, %v370_v48  ;;  %694 = vmatpush1.msra.mxu0 %v392_v45  ;;  %1031 = vmatpush1.msra.mxu1 %v392_v45 }
  0xf8   : > { %v390_v52 = vmul.f32 %v385_v39, %v380_v51  ;;  %v391_v53 = vmul.f32 %v389_v40, %v378_v50 }
  0xfa   : > { %v341_v55 = vpop.permute.xlu0 %340  ;;  %v345_v56 = vpop.permute.xlu1 %344  ;;  %695 = vmatprep.subr.mxu0 %v391_v53  ;;  %1014 = vmatprep.subr.mxu1 %v391_v53 }
  0xfb   : > { %v350_v57 = vsel %vm348_vm7, %v341_v55, %v345_v56  ;;  %v352_v58 = vsel %vm348_vm7, %v345_v56, %v341_v55  ;;  %696 = vmatpush1.msra.mxu0 %v390_v52  ;;  %1032 = vmatpush1.msra.mxu1 %v390_v52 }
  0xfc   : > { %v363_v59 = vmul.f32 %v356_v54, %v352_v58  ;;  %v364_v60 = vmul.f32 %v360_v12, %v350_v57  ;;  %v784_v58 = vld [vmem:[%s329_s16] sm:$0xff] }
  0xfe   : > { %v339_v61 = vpop.permute.xlu0 %338  ;;  %v343_v62 = vpop.permute.xlu1 %342  ;;  %697 = vmatprep.subr.mxu0 %v364_v60  ;;  %1015 = vmatprep.subr.mxu1 %v364_v60 }
  0xff   : > { %v349_v15 = vsel %vm348_vm7, %v339_v61, %v343_v62  ;;  %v351_v16 = vsel %vm348_vm7, %v343_v62, %v339_v61  ;;  %698 = vmatpush1.msra.mxu0 %v363_v59  ;;  %1033 = vmatpush1.msra.mxu1 %v363_v59  ;;  %v785_v62 = vld [vmem:[%s329_s16 + $0x8] sm:$0xff] }
 0x100   : > { %v361_v63 = vmul.f32 %v356_v54, %v351_v16  ;;  %v362_v4 = vmul.f32 %v360_v12, %v349_v15 }
 0x102   : > { %v562_v7 = vpop.permute.xlu0 %561  ;;  %v566_v8 = vpop.permute.xlu1 %565  ;;  %699 = vmatprep.subr.mxu0 %v362_v4  ;;  %1016 = vmatprep.subr.mxu1 %v362_v4 }
 0x103   : > { %v569_v9 = vsel %vm567_vm8, %v562_v7, %v566_v8  ;;  %v571_v10 = vsel %vm567_vm8, %v566_v8, %v562_v7  ;;  %700 = vmatpush1.msra.mxu0 %v361_v63  ;;  %1034 = vmatpush1.msra.mxu1 %v361_v63 }
 0x104   : > { %v582_v11 = vmul.f32 %v983_v5, %v569_v9  ;;  %v583_v14 = vmul.f32 %v984_v6, %v571_v10 }
 0x106   : > { %v560_v17 = vpop.permute.xlu0 %559  ;;  %v564_v2 = vpop.permute.xlu1 %563  ;;  %729 = vmatprep.subr.mxu0 %v583_v14  ;;  %1017 = vmatprep.subr.mxu1 %v583_v14 }
 0x107   : > { %v568_v0 = vsel %vm567_vm8, %v560_v17, %v564_v2  ;;  %v570_v18 = vsel %vm567_vm8, %v564_v2, %v560_v17  ;;  %730 = vmatpush2.msra.mxu0 %v582_v11  ;;  %1035 = vmatpush2.msra.mxu1 %v582_v11 }
 0x108   : > { %v580_v3 = vmul.f32 %v983_v5, %v568_v0  ;;  %v581_v19 = vmul.f32 %v984_v6, %v570_v18 }
 0x10a   : > { %731 = vmatprep.subr.mxu0 %v581_v19  ;;  %1018 = vmatprep.subr.mxu1 %v581_v19 }
 0x10b   : > { %732 = vmatpush2.msra.mxu0 %v580_v3  ;;  %1036 = vmatpush2.msra.mxu1 %v580_v3 }
 0x10c   : > { %734 = vmatmul.mubr.f32.vlgmr.msra.gmra.mxu0 %v588_v20  ;;  %746 = vmatmul.mubr.f32.vlgmr.msra.gmra.mxu1 %v592_v21 }
 0x10d   : > { %986 = vmatprep.mubr.msk.f32.mxu0 %vm656_vm0, %v591_v22  ;;  %988 = vmatprep.mubr.msk.f32.mxu1 %vm656_vm0, %v595_v1 }
 0x110   : > { %740 = vmatmul.mubr.f32.gmra.mxu0 %v590_v13  ;;  %752 = vmatmul.mubr.f32.gmra.mxu1 %v594_v23 }
 0x113   : > { %v644_v24 = vpop.permute.xlu1 %643  ;;  %v639_v25 = vpop.permute.xlu0 %638 }
 0x117   : > { %v649_v32 = vpop.permute.xlu1 %648  ;;  %v654_v44 = vpop.permute.xlu0 %653 }
 0x1cc   : > { %v735_v26 = vpop.f32.mrf.mxu0  ;;  %v747_v28 = vpop.f32.mrf.mxu1 }
 0x1cd   : > { %v736_v27 = vadd.f32 %v735_v26, %v639_v25  ;;  %v748_v37 = vadd.f32 %v747_v28, %v649_v32 }
 0x1ce   : > { %v737_v29 = vpop.f32.mrf.mxu0  ;;  %v749_v36 = vpop.f32.mrf.mxu1 }
 0x1cf   : > { %v758_v30 = vmul.f32 0.5, %v736_v27  ;;  %v738_v31 = vadd.f32 %v737_v29, %v639_v25  ;;  %v750_v43 = vadd.f32 %v749_v36, %v649_v32 }
 0x1d0   : > { %v741_v33 = vpop.f32.mrf.mxu0  ;;  %v753_v42 = vpop.f32.mrf.mxu1 }
 0x1d1   : > { %1122 = vtanh.f32 %v758_v30  ;;  %v759_v34 = vmul.f32 0.5, %v738_v31  ;;  %v742_v35 = vadd.f32 %v741_v33, %v644_v24  ;;  %v754_v46 = vadd.f32 %v753_v42, %v654_v44 }
 0x1d2   : > { %v743_v38 = vpop.f32.mrf.mxu0  ;;  %v755_v45 = vpop.f32.mrf.mxu1 }
 0x1d3   : > { %1124 = vtanh.f32 %v759_v34  ;;  %v766_v39 = vmul.f32 0.5, %v742_v35  ;;  %v744_v40 = vadd.f32 %v743_v38, %v644_v24  ;;  %v756_v47 = vadd.f32 %v755_v45, %v654_v44 }
 0x1d4   : > { %v776_v50 = vmul.f32 0.5, %v754_v46 }
 0x1d5   : > { %1126 = vtanh.f32 %v766_v39  ;;  %v767_v41 = vmul.f32 0.5, %v744_v40  ;;  %v777_v53 = vmul.f32 0.5, %v756_v47 }
 0x1d6   : > { %1128 = vtanh.f32 %v748_v37 }
 0x1d7   : > { %1130 = vtanh.f32 %v767_v41 }
 0x1d8   : > { %1132 = vtanh.f32 %v750_v43 }
 0x1d9   : > { %1134 = vtanh.f32 %v776_v50 }
 0x1da   : > { %1136 = vtanh.f32 %v777_v53 }
 0x1de   : > { %v1123_v48 = vpop.eup %1122 }
 0x1df   : > { %v762_v49 = vmul.f32 0.5, %v1123_v48 }
 0x1e0   : > { %v1125_v51 = vpop.eup %1124 }
 0x1e1   : > { %v763_v52 = vmul.f32 0.5, %v1125_v51  ;;  %v764_v55 = vadd.f32 0.5, %v762_v49 }
 0x1e2   : > { %v1127_v54 = vpop.eup %1126 }
 0x1e3   : > { %v1129_v12 = vpop.eup %1128  ;;  %v770_v56 = vmul.f32 0.5, %v1127_v54  ;;  %v765_v59 = vadd.f32 0.5, %v763_v52 }
 0x1e4   : > { %v1131_v57 = vpop.eup %1130  ;;  %v788_v16 = vmul.f32 %v1129_v12, %v764_v55 }
 0x1e5   : > { %v772_v60 = vadd.f32 0.5, %v770_v56  ;;  %v771_v61 = vmul.f32 0.5, %v1131_v57  ;;  %v1133_v4 = vpop.eup %1132 }
 0x1e6   : > { %v789_v7 = vmul.f32 %v1133_v4, %v765_v59 }
 0x1e7   : > { %v786_v15 = vmul.f32 %v784_v58, %v772_v60  ;;  %v773_v63 = vadd.f32 0.5, %v771_v61 }
 0x1e9   : > { %v790_v5 = vadd.f32 %v788_v16, %v786_v15  ;;  %v787_v6 = vmul.f32 %v785_v62, %v773_v63 }
 0x1eb   : > { %1138 = vtanh.f32 %v790_v5  ;;  %v791_v8 = vadd.f32 %v789_v7, %v787_v6  ;;  %798 = vst [vmem:[%s324_s26] sm:$0xff] %v790_v5 }
 0x1ed   : > { %1140 = vtanh.f32 %v791_v8  ;;  %799 = vst [vmem:[%s324_s26 + $0x8] sm:$0xff] %v791_v8 }
 0x1ee   : > { %1235 = shalt.err (!%p1232_p11)
}
 0x1ef   : > { %s1236_s20 = scalar_lea.hbm %s1691_s14, 256  ;;  %s1240_s13 = scalar_lea.hbm %s1754_s6, 512 }
 0x1f0   : > { %p1237_p9 = scmp.ne.s32.totalorder %s1691_s14, %s1236_s20  ;;  %p1241_p6 = scmp.lt.s32.totalorder %s1691_s14, %s1754_s6 }
 0x1f1   : > { %p1242_p8 = scmp.lt.s32.totalorder %s1240_s13, %s1236_s20 }
 0x1f2   : > { %p1238_p1 = pnand %p1237_p9, %p1773_p7 }
 0x1f3   : > { %p1243_p5 = por %p1242_p8, %p1241_p6 }
 0x1f4   : > { %p1239_p4 = pneg %p1238_p1 }
 0x1f6   : > { %p1244_p2 = pnand %p1243_p5, %p1239_p4 }
 0x1f8   : > { %1247 = shalt.err (!%p1244_p2)
}
 0x1f9   : > { %1048 = dma.vmem_to_hbm [thread:$0]  (%p1773_p7), %s835_s11, 256, %s1691_s14, %s806_s29   ;;  %v1135_v9 = vpop.eup %1134 }
 0x1fa   : > { %v1137_v10 = vpop.eup %1136  ;;  %v780_v11 = vmul.f32 0.5, %v1135_v9  ;;  %s317_s27 = scalar_lea.vmem [#allocation9], %s979_s8  ;;  %s818_s11 = scalar_lea.hbm %s1753_s5, %s999_s10 }
 0x1fb   : > { %v781_v14 = vmul.f32 0.5, %v1137_v10  ;;  %v1139_v2 = vpop.eup %1138  ;;  %s820_s17 = sshll.u32 %s317_s27, 4  ;;  %s801_s14 = scalar_lea.sflag [#allocation5], %s1509_s12  ;;  %s821_s17 = int_to_ptr.vmem [resolvable:$true] %s820_s17 }
 0x1fc   : > { %v782_v17 = vadd.f32 0.5, %v780_v11  ;;  %v1141_v3 = vpop.eup %1140  ;;  %s1248_s29 = scalar_lea.vmem %s821_s17, 256  ;;  %s1337_s8 = smov [#allocation9]  }
 0x1fd   : > { %v783_v0 = vadd.f32 0.5, %v781_v14  ;;  %p1249_p12 = scmp.ne.s32.totalorder %s821_s17, %s1248_s29  ;;  %s1252_s16 = sshll.u32 %s1337_s8, 4  ;;  %s1253_s16 = int_to_ptr.vmem [resolvable:$false] %s1252_s16 }
 0x1fe   : > { %v794_v18 = vmul.f32 %v1139_v2, %v782_v17  ;;  %s1254_s26 = scalar_lea.vmem %s1253_s16, 512  ;;  %p1255_p10 = scmp.lt.s32.totalorder %s821_s17, %s1253_s16 }
 0x1ff   : > { %v795_v19 = vmul.f32 %v1141_v3, %v783_v0  ;;  %p1250_p13 = pnand %p1249_p12, %p1773_p7  ;;  %p1256_p3 = scmp.lt.s32.totalorder %s1254_s26, %s1248_s29 }
 0x200   : > { %796 = vst [vmem:[%s317_s27] sm:$0xff] %v794_v18 }
 0x201   : > { %797 = vst [vmem:[%s317_s27 + $0x8] sm:$0xff] %v795_v19  ;;  %p1251_p0 = pneg %p1250_p13  ;;  %p1257_p11 = por %p1256_p3, %p1255_p10 }
 0x203   : > { %p1258_p9 = pnand %p1257_p11, %p1251_p0 }
 0x205   : > { %1261 = shalt.err (!%p1258_p9)
}
 0x206   : > { %s1262_s25 = scalar_lea.hbm %s818_s11, 256  ;;  %s1266_s13 = scalar_lea.hbm %s1753_s5, 512 }
 0x207   : > { %p1263_p1 = scmp.ne.s32.totalorder %s818_s11, %s1262_s25  ;;  %p1267_p8 = scmp.lt.s32.totalorder %s818_s11, %s1753_s5 }
 0x208   : > { %p1268_p5 = scmp.lt.s32.totalorder %s1266_s13, %s1262_s25 }
 0x209   : > { %p1264_p4 = pnand %p1263_p1, %p1773_p7 }
 0x20a   : > { %p1269_p2 = por %p1268_p5, %p1267_p8 }
 0x20b   : > { %p1265_p6 = pneg %p1264_p4 }
 0x20d   : > { %p1270_p12 = pnand %p1269_p2, %p1265_p6 }
 0x20f   : > { %1273 = shalt.err (!%p1270_p12)
}
 0x210   : > { %1047 = dma.vmem_to_hbm [thread:$0]  (%p1773_p7), %s821_s17, 256, %s818_s11, %s801_s14  }
 0x211 PF: > { %s846_s27 = sand.u32 1, %s1308_s21   ;;  %p1774_p13 = scmp.ne.s32.totalorder %s1762_s28, 0 }
 0x212   : > { %p1775_p0 = scmp.ge.s32.totalorder %s1320_s24, 2  ;;  %s847_s18 = scalar_lea.sflag [#allocation5], %s846_s27 }
 0x214   : > { %p1063_p10 = pnand %p1775_p0, %p1774_p13 }
 0x216   : > { %p1064_p3 = pneg %p1063_p10 }
 0x218   : > { %1299 = dma.done.wait (%p1064_p3), %s847_s18, 256  }
 0x219   : > { %1301 = vsyncadd (%p1064_p3), %s847_s18, 4294967040  ;;  %s856_s20 = scalar_lea.sflag [#allocation11], %s846_s27 }
 0x21a   : > { %1303 = dma.done.wait (%p1064_p3), %s856_s20, 256  }
 0x21b   : > { %1305 = vsyncadd (%p1064_p3), %s856_s20, 4294967040  ;;  %p24_p7 = scmp.ge.s32.totalorder %s1451_s19, 4   ;;  %s1776_s21 = smov %s1312_s22 }
 0x21c   : > { %s1777_s22 = smov %s1316_s23  ;;  %s1778_s23 = smov %s1467_s7 }
 0x21d   : > { %s1779_s24 = smov %s1451_s19  ;;  %26 = sbr.rel (!%p24_p7) target bundleno = 8 (0x8), region = 113 }
 0x222   :  { %861 = vsyncpa [#allocation4], 1 }
 0x223   :  { %863 = vsyncpa [#allocation4 + $0x1], 1 }
 0x224   :  { %864 = vsyncpa [#allocation7], 1 }
 0x225   :  { %865 = vsyncpa [#allocation5], 1 }
 0x226   :  { %867 = vsyncpa [#allocation5 + $0x1], 1 }
 0x227   :  { %868 = vsyncpa [#allocation11], 1 }
 0x228   :  { %870 = vsyncpa [#allocation11 + $0x1], 1 }

</bundles_post_ra>
